<compile_context>
chip_gen: v7x
topology: tpu7x:2x2x1
jax: 0.10.0
libtpu: 0.0.40
codegen_flags: <defaults>
</compile_context>

<pallas_src>
import functools

import jax
import jax.numpy as jnp
from jax.experimental import pallas as pl
from jax.experimental.pallas import tpu as pltpu


_LN_EPS = 1e-5


def _layernorm(x, gamma, beta, eps=_LN_EPS):
    # PyTorch LayerNorm: biased variance over the last axis; rsqrt -> EUP.
    mean = jnp.mean(x, axis=-1, keepdims=True)
    var = jnp.mean(jnp.square(x - mean), axis=-1, keepdims=True)
    return (x - mean) * jax.lax.rsqrt(var + eps) * gamma + beta


# ---------------------------------------------------------------------------
# Fused kernel: embed+concat (d==0) -> transformer block d -> toprobs (d==last)
# ---------------------------------------------------------------------------
def _fused_kernel(x_ref, h_ref, p_ref, wt_ref, btk_ref, wp_ref, bp_ref,
                  bias_ref,
                  wqkv_ref, wu_ref, bu_ref, g1_ref, be1_ref,
                  w1_ref, bb1_ref, w2_ref, bb2_ref, g2_ref, be2_ref,
                  wout_ref, bout_ref,
                  probs_ref, tokens_ref,
                  act_ref, *,
                  batch, seq, nx, nh, np_, emb, heads, compute_dtype):
    d = pl.program_id(0)
    cd = compute_dtype
    bt = batch * seq
    he = heads * emb

    # ---- grid step 0: token / phase embedding + concat into resident act ----
    @pl.when(d == 0)
    def _():
        tok = jnp.dot(x_ref[...], wt_ref[...],
                      preferred_element_type=jnp.float32) + btk_ref[...]   # (B*nx, E)
        ph = jnp.dot(p_ref[...], wp_ref[...],
                     preferred_element_type=jnp.float32) + bp_ref[...]     # (B*np, E)
        for bi in range(batch):                         # batch tiny & static
            base = bi * seq
            act_ref[base:base + nx, :] = tok[bi * nx:(bi + 1) * nx, :]
            act_ref[base + nx:base + nx + nh, :] = h_ref[bi].astype(jnp.float32)
            act_ref[base + nx + nh:base + seq, :] = ph[bi * np_:(bi + 1) * np_, :]
        for bi in range(batch):                         # second module output
            tokens_ref[bi, :, :] = act_ref[bi * seq:(bi + 1) * seq, :].astype(
                tokens_ref.dtype)

    # ---- transformer block d (activation resident in VMEM scratch) ----------
    x = act_ref[...]                                    # (bt, E) f32 residual path
    xc = x.astype(cd)
    scale = jnp.float32(float(emb) ** -0.5)             # == dividing q and k by e**0.25

    qkv = jnp.dot(xc, wqkv_ref[...], preferred_element_type=jnp.float32)  # (bt, 3*H*E)
    bias = bias_ref[...]                                # (bt, bt) additive mask bias

    acc = jnp.zeros((bt, emb), jnp.float32)             # unifyheads accumulator
    for hh in range(heads):                             # heads small -> unrolled
        q = qkv[:, hh * emb:(hh + 1) * emb] * scale
        k = qkv[:, he + hh * emb:he + (hh + 1) * emb]
        v = qkv[:, 2 * he + hh * emb:2 * he + (hh + 1) * emb]

        # (bt, E) x (bt, E) contracted on E -> (bt, bt); cross-batch entries are
        # killed by the -1e9 block-diagonal bias before softmax.
        dot = jax.lax.dot_general(q.astype(cd), k.astype(cd),
                                  (((1,), (1,)), ((), ())),
                                  preferred_element_type=jnp.float32) + bias
        m = jnp.max(dot, axis=-1, keepdims=True)
        pmat = jnp.exp(dot - m)
        denom = jnp.sum(pmat, axis=-1, keepdims=True)
        pmat = pmat * pl.reciprocal(denom, approx=True)  # softmax (EUP recip)

        head_out = jnp.dot(pmat.astype(cd), v.astype(cd),
                           preferred_element_type=jnp.float32)              # (bt, E)
        # unifyheads: accumulate head_out @ Wu[head] (no lane-axis concat)
        acc = acc + jnp.dot(head_out.astype(cd), wu_ref[hh],
                            preferred_element_type=jnp.float32)

    attended = acc + bu_ref[...]
    h1 = _layernorm(attended + x, g1_ref[...], be1_ref[...])
    ff = jnp.dot(h1.astype(cd), w1_ref[...],
                 preferred_element_type=jnp.float32) + bb1_ref[...]
    ff = jnp.maximum(ff, 0.0)
    ff = jnp.dot(ff.astype(cd), w2_ref[...],
                 preferred_element_type=jnp.float32) + bb2_ref[...]
    out = _layernorm(ff + h1, g2_ref[...], be2_ref[...])

    act_ref[...] = out                                  # carried to next grid step

    # ---- last grid step: output projection (toprobs) ------------------------
    @pl.when(d == pl.num_programs(0) - 1)
    def _():
        probs_ref[...] = (jnp.dot(out.astype(cd), wout_ref[...],
                                  preferred_element_type=jnp.float32)
                          + bout_ref[...]).astype(probs_ref.dtype)


# ---------------------------------------------------------------------------
# Wrapper: weight stacking, additive mask bias, single pallas_call
# ---------------------------------------------------------------------------
def transformer1_forward(x, h, p, params, *, heads, mask=None,
                         compute_dtype=jnp.float32):
    batch, nx, input_dim = x.shape
    _, nh, emb = h.shape
    _, np_, phase_num = p.shape
    seq = nx + nh + np_
    bt = batch * seq
    blocks = params["blocks"]
    depth = len(blocks)
    output_dim = params["w_out"].shape[1]

    x_flat = x.reshape(batch * nx, input_dim)
    p_flat = p.reshape(batch * np_, phase_num)

    # Additive attention bias: user mask on the per-batch diagonal blocks,
    # -1e9 everywhere off-diagonal (so batch can be flattened out of attention).
    neg = jnp.float32(-1e9)
    if mask is not None:
        blk_bias = jnp.where(mask.astype(jnp.float32) == 0.0, neg,
                             jnp.float32(0.0)).astype(jnp.float32)
    else:
        blk_bias = jnp.zeros((seq, seq), jnp.float32)
    eye = jnp.eye(batch, dtype=jnp.float32)
    diag = jnp.kron(eye, jnp.ones((seq, seq), jnp.float32))
    attn_bias = jnp.kron(eye, blk_bias) + (1.0 - diag) * neg      # (bt, bt)

    # Stacked per-block weights (leading depth axis -> one DMA per grid step).
    def stk(name):
        return jnp.stack([b[name] for b in blocks])

    wqkv = jnp.stack([jnp.concatenate([b["wq"], b["wk"], b["wv"]], axis=1)
                      for b in blocks])                            # (D, E, 3*H*E)
    wu = jnp.stack([b["wu"].reshape(heads, emb, emb) for b in blocks])  # (D, H, E, E)
    w1, w2 = stk("w1"), stk("w2")
    w_out = params["w_out"]
    if compute_dtype != jnp.float32:                               # v6e/v7x option
        wqkv, wu, w1, w2, w_out = (a.astype(compute_dtype)
                                   for a in (wqkv, wu, w1, w2, w_out))

    bu, g1, be1 = stk("bu"), stk("g1"), stk("be1")
    bb1, bb2 = stk("bb1"), stk("bb2")
    g2, be2 = stk("g2"), stk("be2")

    def const_spec(shape):
        n = len(shape)

        def idx(d):
            return (0,) * n
        return pl.BlockSpec(tuple(shape), idx)

    def stacked_spec(shape):
        n = len(shape) - 1

        def idx(d):
            return (d,) + (0,) * n
        return pl.BlockSpec((None,) + tuple(shape[1:]), idx)

    inputs = [x_flat, h, p_flat,
              params["w_tok"], params["b_tok"], params["w_ph"], params["b_ph"],
              attn_bias,
              wqkv, wu, bu, g1, be1, w1, bb1, w2, bb2, g2, be2,
              w_out, params["b_out"]]
    in_specs = ([const_spec(a.shape) for a in inputs[:8]]
                + [stacked_spec(a.shape) for a in inputs[8:19]]
                + [const_spec(a.shape) for a in inputs[19:]])

    kernel = functools.partial(
        _fused_kernel, batch=batch, seq=seq, nx=nx, nh=nh, np_=np_,
        emb=emb, heads=heads, compute_dtype=compute_dtype)

    probs_flat, tokens = pl.pallas_call(
        kernel,
        out_shape=(jax.ShapeDtypeStruct((bt, output_dim), jnp.float32),
                   jax.ShapeDtypeStruct((batch, seq, emb), jnp.float32)),
        grid=(depth,),
        in_specs=in_specs,
        out_specs=(const_spec((bt, output_dim)),
                   const_spec((batch, seq, emb))),
        scratch_shapes=[pltpu.VMEM((bt, emb), jnp.float32)],
        compiler_params=pltpu.CompilerParams(dimension_semantics=("arbitrary",)),
    )(*inputs)

    return probs_flat.reshape(batch, seq, output_dim), tokens


# ---------------------------------------------------------------------------
# Pure-JAX reference mirroring the PyTorch module
# ---------------------------------------------------------------------------
def reference_block(x, mask, p, *, heads):
    b, t, e = x.shape
    h = heads
    scale = float(e) ** 0.25
    q = (x @ p["wq"]).reshape(b, t, h, e).transpose(0, 2, 1, 3) / scale
    k = (x @ p["wk"]).reshape(b, t, h, e).transpose(0, 2, 1, 3) / scale
    v = (x @ p["wv"]).reshape(b, t, h, e).transpose(0, 2, 1, 3)
    dot = jnp.einsum("bhqe,bhke->bhqk", q, k)
    if mask is not None:
        dot = jnp.where(mask[None, None, :, :] == 0, -1e9, dot)
    a = jax.nn.softmax(dot, axis=-1)
    out = jnp.einsum("bhqk,bhke->bhqe", a, v)
    out = out.transpose(0, 2, 1, 3).reshape(b, t, h * e)
    attended = out @ p["wu"] + p["bu"][0]

    def ln(y, g, be):
        mu = jnp.mean(y, axis=-1, keepdims=True)
        var = jnp.mean((y - mu) ** 2, axis=-1, keepdims=True)
        return (y - mu) / jnp.sqrt(var + _LN_EPS) * g[0] + be[0]

    h1 = ln(attended + x, p["g1"], p["be1"])
    ff = jnp.maximum(h1 @ p["w1"] + p["bb1"][0], 0.0) @ p["w2"] + p["bb2"][0]
    return ln(ff + h1, p["g2"], p["be2"])


def reference_transformer1(x, h, p, mask, params, *, heads):
    tok = x @ params["w_tok"] + params["b_tok"][0]
    ph = p @ params["w_ph"] + params["b_ph"][0]
    tokens = jnp.concatenate([tok, h, ph], axis=1)
    y = tokens
    for blk in params["blocks"]:
        y = reference_block(y, mask, blk, heads=heads)
    b, t, e = y.shape
    probs = (y.reshape(b * t, e) @ params["w_out"] + params["b_out"][0]).reshape(b, t, -1)
    return probs, tokens


# ---------------------------------------------------------------------------
# Parameter init (effective (in, out) layouts == torch weight.T)
# ---------------------------------------------------------------------------
def init_params(key, *, input_dim, emb, heads, depth, phase_num, output_dim,
                ff_hidden_mult=4):
    keys = iter(jax.random.split(key, 64))
    s = 0.1

    def nrm(shape):
        return jax.random.normal(next(keys), shape, jnp.float32) * s

    params = {
        "w_tok": nrm((input_dim, emb)), "b_tok": nrm((1, emb)),
        "w_ph": nrm((phase_num, emb)), "b_ph": nrm((1, emb)),
        "w_out": nrm((emb, output_dim)), "b_out": nrm((1, output_dim)),
        "blocks": [],
    }
    for _ in range(depth):
        params["blocks"].append({
            "wq": nrm((emb, heads * emb)),
            "wk": nrm((emb, heads * emb)),
            "wv": nrm((emb, heads * emb)),
            "wu": nrm((heads * emb, emb)),
            "bu": nrm((1, emb)),
            "g1": jnp.ones((1, emb), jnp.float32),
            "be1": jnp.zeros((1, emb), jnp.float32),
            "w1": nrm((emb, ff_hidden_mult * emb)),
            "bb1": nrm((1, ff_hidden_mult * emb)),
            "w2": nrm((ff_hidden_mult * emb, emb)),
            "bb2": nrm((1, emb)),
            "g2": jnp.ones((1, emb), jnp.float32),
            "be2": jnp.zeros((1, emb), jnp.float32),
        })
    return params


if __name__ == "__main__":
    BATCH, N_OBS_TOKENS, INPUT_DIM = 2, 6, 16
    EMB, HEADS, DEPTH = 32, 2, 2
    PHASE_NUM, OUTPUT_DIM = 8, 8
    SEQ = N_OBS_TOKENS + 1 + 1          # obs tokens + hidden token + phase token

    key = jax.random.PRNGKey(0)
    kx, kh, kp, kw = jax.random.split(key, 4)
    x = jax.random.normal(kx, (BATCH, N_OBS_TOKENS, INPUT_DIM), jnp.float32)
    hidden = jax.random.normal(kh, (BATCH, 1, EMB), jnp.float32)
    phase = jax.random.normal(kp, (BATCH, 1, PHASE_NUM), jnp.float32)
    params = init_params(kw, input_dim=INPUT_DIM, emb=EMB, heads=HEADS,
                         depth=DEPTH, phase_num=PHASE_NUM, output_dim=OUTPUT_DIM)

    # 1) mask=None path (numerically identical to the all-ones mask the caller uses)
    probs, tokens = transformer1_forward(x, hidden, phase, params,
                                         heads=HEADS, mask=None)
    probs = jax.block_until_ready(probs)
    probs_ref, tokens_ref = reference_transformer1(x, hidden, phase, None,
                                                   params, heads=HEADS)
    assert probs.shape == (BATCH, SEQ, OUTPUT_DIM)
    assert tokens.shape == (BATCH, SEQ, EMB)
    assert jnp.allclose(tokens, tokens_ref, atol=2e-3, rtol=2e-3), "tokens mismatch"
    assert jnp.allclose(probs, probs_ref, atol=2e-3, rtol=2e-3), "probs mismatch (no mask)"

    # 2) non-trivial mask exercises the masked_fill(mask == 0, -1e9) path
    mask = jnp.tril(jnp.ones((SEQ, SEQ), jnp.float32))
    probs_m, _ = transformer1_forward(x, hidden, phase, params,
                                      heads=HEADS, mask=mask)
    probs_m = jax.block_until_ready(probs_m)
    probs_m_ref, _ = reference_transformer1(x, hidden, phase, mask,
                                            params, heads=HEADS)
    assert jnp.allclose(probs_m, probs_m_ref, atol=2e-3, rtol=2e-3), "probs mismatch (masked)"

    print("KERNEL_OK")
</pallas_src>

<mosaic_0001>
module attributes {stable_mosaic.version = 11 : i64} {
  func.func @_fused_kernel(%arg0: i32, %arg1: memref<12x16xf32, #tpu.memory_space<vmem>>, %arg2: memref<2x1x32xf32, #tpu.memory_space<vmem>>, %arg3: memref<2x8xf32, #tpu.memory_space<vmem>>, %arg4: memref<16x32xf32, #tpu.memory_space<vmem>>, %arg5: memref<1x32xf32, #tpu.memory_space<vmem>>, %arg6: memref<8x32xf32, #tpu.memory_space<vmem>>, %arg7: memref<1x32xf32, #tpu.memory_space<vmem>>, %arg8: memref<16x16xf32, #tpu.memory_space<vmem>>, %arg9: memref<1x32x192xf32, #tpu.memory_space<vmem>>, %arg10: memref<1x2x32x32xf32, #tpu.memory_space<vmem>>, %arg11: memref<1x1x32xf32, #tpu.memory_space<vmem>>, %arg12: memref<1x1x32xf32, #tpu.memory_space<vmem>>, %arg13: memref<1x1x32xf32, #tpu.memory_space<vmem>>, %arg14: memref<1x32x128xf32, #tpu.memory_space<vmem>>, %arg15: memref<1x1x128xf32, #tpu.memory_space<vmem>>, %arg16: memref<1x128x32xf32, #tpu.memory_space<vmem>>, %arg17: memref<1x1x32xf32, #tpu.memory_space<vmem>>, %arg18: memref<1x1x32xf32, #tpu.memory_space<vmem>>, %arg19: memref<1x1x32xf32, #tpu.memory_space<vmem>>, %arg20: memref<32x8xf32, #tpu.memory_space<vmem>>, %arg21: memref<1x8xf32, #tpu.memory_space<vmem>>, %arg22: memref<16x8xf32, #tpu.memory_space<vmem>>, %arg23: memref<2x8x32xf32, #tpu.memory_space<vmem>>, %arg24: memref<16x32xf32, #tpu.memory_space<vmem>>) attributes {dimension_semantics = [#tpu.dimension_semantics<arbitrary>], iteration_bounds = array<i64: 2>, scalar_prefetch = 0 : i64, scratch_operands = 1 : i64, tpu.core_type = #tpu.core_type<tc>, window_params = [{pipeline_mode = #tpu.pipeline_mode<synchronous>, transform_indices = @transform_0, window_bounds = array<i64: 12, 16>}, {pipeline_mode = #tpu.pipeline_mode<synchronous>, transform_indices = @transform_1, window_bounds = array<i64: 2, 1, 32>}, {pipeline_mode = #tpu.pipeline_mode<synchronous>, transform_indices = @transform_2, window_bounds = array<i64: 2, 8>}, {pipeline_mode = #tpu.pipeline_mode<synchronous>, transform_indices = @transform_3, window_bounds = array<i64: 16, 32>}, {pipeline_mode = #tpu.pipeline_mode<synchronous>, transform_indices = @transform_4, window_bounds = array<i64: 1, 32>}, {pipeline_mode = #tpu.pipeline_mode<synchronous>, transform_indices = @transform_5, window_bounds = array<i64: 8, 32>}, {pipeline_mode = #tpu.pipeline_mode<synchronous>, transform_indices = @transform_6, window_bounds = array<i64: 1, 32>}, {pipeline_mode = #tpu.pipeline_mode<synchronous>, transform_indices = @transform_7, window_bounds = array<i64: 16, 16>}, {transform_indices = @transform_8, window_bounds = array<i64: 1, 32, 192>}, {transform_indices = @transform_9, window_bounds = array<i64: 1, 2, 32, 32>}, {transform_indices = @transform_10, window_bounds = array<i64: 1, 1, 32>}, {transform_indices = @transform_11, window_bounds = array<i64: 1, 1, 32>}, {transform_indices = @transform_12, window_bounds = array<i64: 1, 1, 32>}, {transform_indices = @transform_13, window_bounds = array<i64: 1, 32, 128>}, {transform_indices = @transform_14, window_bounds = array<i64: 1, 1, 128>}, {transform_indices = @transform_15, window_bounds = array<i64: 1, 128, 32>}, {transform_indices = @transform_16, window_bounds = array<i64: 1, 1, 32>}, {transform_indices = @transform_17, window_bounds = array<i64: 1, 1, 32>}, {transform_indices = @transform_18, window_bounds = array<i64: 1, 1, 32>}, {pipeline_mode = #tpu.pipeline_mode<synchronous>, transform_indices = @transform_19, window_bounds = array<i64: 32, 8>}, {pipeline_mode = #tpu.pipeline_mode<synchronous>, transform_indices = @transform_20, window_bounds = array<i64: 1, 8>}, {pipeline_mode = #tpu.pipeline_mode<synchronous>, transform_indices = @transform_21, window_bounds = array<i64: 16, 8>}, {pipeline_mode = #tpu.pipeline_mode<synchronous>, transform_indices = @transform_22, window_bounds = array<i64: 2, 8, 32>}]} {
    %c0_i32 = arith.constant 0 : i32
    %0 = arith.cmpi eq, %arg0, %c0_i32 : i32
    %1 = arith.extui %0 : i1 to i32
    %c0_i32_0 = arith.constant 0 : i32
    %2 = arith.cmpi ne, %1, %c0_i32_0 : i32
    scf.if %2 {
      %c0_70 = arith.constant 0 : index
      %c0_71 = arith.constant 0 : index
      %131 = vector.load %arg1[%c0_70, %c0_71] : memref<12x16xf32, #tpu.memory_space<vmem>>, vector<12x16xf32>
      %c0_72 = arith.constant 0 : index
      %c0_73 = arith.constant 0 : index
      %132 = vector.load %arg4[%c0_72, %c0_73] : memref<16x32xf32, #tpu.memory_space<vmem>>, vector<16x32xf32>
      %cst_74 = arith.constant dense<0.000000e+00> : vector<12x32xf32>
      %133 = tpu.matmul %131, %132, %cst_74 {dimension_numbers = #tpu.dot_dimension_numbers<[1], [0], [0], [1], [0, 0, 1, 1], [], []>} : vector<12x16xf32>, vector<16x32xf32>, vector<12x32xf32> -> vector<12x32xf32>
      %c0_75 = arith.constant 0 : index
      %c0_76 = arith.constant 0 : index
      %134 = vector.load %arg5[%c0_75, %c0_76] : memref<1x32xf32, #tpu.memory_space<vmem>>, vector<1x32xf32>
      %135 = vector.broadcast %134 : vector<1x32xf32> to vector<12x32xf32>
      %136 = arith.addf %133, %135 : vector<12x32xf32>
      %c0_77 = arith.constant 0 : index
      %c0_78 = arith.constant 0 : index
      %137 = vector.load %arg3[%c0_77, %c0_78] : memref<2x8xf32, #tpu.memory_space<vmem>>, vector<2x8xf32>
      %c0_79 = arith.constant 0 : index
      %c0_80 = arith.constant 0 : index
      %138 = vector.load %arg6[%c0_79, %c0_80] : memref<8x32xf32, #tpu.memory_space<vmem>>, vector<8x32xf32>
      %cst_81 = arith.constant dense<0.000000e+00> : vector<2x32xf32>
      %139 = tpu.matmul %137, %138, %cst_81 {dimension_numbers = #tpu.dot_dimension_numbers<[1], [0], [0], [1], [0, 0, 1, 1], [], []>} : vector<2x8xf32>, vector<8x32xf32>, vector<2x32xf32> -> vector<2x32xf32>
      %c0_82 = arith.constant 0 : index
      %c0_83 = arith.constant 0 : index
      %140 = vector.load %arg7[%c0_82, %c0_83] : memref<1x32xf32, #tpu.memory_space<vmem>>, vector<1x32xf32>
      %141 = vector.broadcast %140 : vector<1x32xf32> to vector<2x32xf32>
      %142 = arith.addf %139, %141 : vector<2x32xf32>
      %143 = vector.extract_strided_slice %136 {offsets = [0, 0], sizes = [6, 32], strides = [1, 1]} : vector<12x32xf32> to vector<6x32xf32>
      %c0_84 = arith.constant 0 : index
      %c0_85 = arith.constant 0 : index
      %144 = vector.load %arg24[%c0_84, %c0_85] : memref<16x32xf32, #tpu.memory_space<vmem>>, vector<6x32xf32>
      tpu.vector_store %arg24[%c0_84, %c0_85], %143 {strides = array<i32>} : memref<16x32xf32, #tpu.memory_space<vmem>>, vector<6x32xf32>,
      %c0_86 = arith.constant 0 : index
      %c0_87 = arith.constant 0 : index
      %c0_88 = arith.constant 0 : index
      %145 = vector.load %arg2[%c0_86, %c0_87, %c0_88] : memref<2x1x32xf32, #tpu.memory_space<vmem>>, vector<1x1x32xf32>
      %146 = vector.shape_cast %145 : vector<1x1x32xf32> to vector<1x32xf32>
      %c6 = arith.constant 6 : index
      %c0_89 = arith.constant 0 : index
      %147 = vector.load %arg24[%c6, %c0_89] : memref<16x32xf32, #tpu.memory_space<vmem>>, vector<1x32xf32>
      tpu.vector_store %arg24[%c6, %c0_89], %146 {strides = array<i32>} : memref<16x32xf32, #tpu.memory_space<vmem>>, vector<1x32xf32>,
      %148 = vector.extract_strided_slice %142 {offsets = [0, 0], sizes = [1, 32], strides = [1, 1]} : vector<2x32xf32> to vector<1x32xf32>
      %c7 = arith.constant 7 : index
      %c0_90 = arith.constant 0 : index
      %149 = vector.load %arg24[%c7, %c0_90] : memref<16x32xf32, #tpu.memory_space<vmem>>, vector<1x32xf32>
      tpu.vector_store %arg24[%c7, %c0_90], %148 {strides = array<i32>} : memref<16x32xf32, #tpu.memory_space<vmem>>, vector<1x32xf32>,
      %150 = vector.extract_strided_slice %136 {offsets = [6, 0], sizes = [6, 32], strides = [1, 1]} : vector<12x32xf32> to vector<6x32xf32>
      %c8 = arith.constant 8 : index
      %c0_91 = arith.constant 0 : index
      %151 = vector.load %arg24[%c8, %c0_91] : memref<16x32xf32, #tpu.memory_space<vmem>>, vector<6x32xf32>
      tpu.vector_store %arg24[%c8, %c0_91], %150 {strides = array<i32>} : memref<16x32xf32, #tpu.memory_space<vmem>>, vector<6x32xf32>,
      %c1_92 = arith.constant 1 : index
      %c0_93 = arith.constant 0 : index
      %c0_94 = arith.constant 0 : index
      %152 = vector.load %arg2[%c1_92, %c0_93, %c0_94] : memref<2x1x32xf32, #tpu.memory_space<vmem>>, vector<1x1x32xf32>
      %153 = vector.shape_cast %152 : vector<1x1x32xf32> to vector<1x32xf32>
      %c14 = arith.constant 14 : index
      %c0_95 = arith.constant 0 : index
      %154 = vector.load %arg24[%c14, %c0_95] : memref<16x32xf32, #tpu.memory_space<vmem>>, vector<1x32xf32>
      tpu.vector_store %arg24[%c14, %c0_95], %153 {strides = array<i32>} : memref<16x32xf32, #tpu.memory_space<vmem>>, vector<1x32xf32>,
      %155 = vector.extract_strided_slice %142 {offsets = [1, 0], sizes = [1, 32], strides = [1, 1]} : vector<2x32xf32> to vector<1x32xf32>
      %c15 = arith.constant 15 : index
      %c0_96 = arith.constant 0 : index
      %156 = vector.load %arg24[%c15, %c0_96] : memref<16x32xf32, #tpu.memory_space<vmem>>, vector<1x32xf32>
      tpu.vector_store %arg24[%c15, %c0_96], %155 {strides = array<i32>} : memref<16x32xf32, #tpu.memory_space<vmem>>, vector<1x32xf32>,
      %c0_97 = arith.constant 0 : index
      %c0_98 = arith.constant 0 : index
      %157 = vector.load %arg24[%c0_97, %c0_98] : memref<16x32xf32, #tpu.memory_space<vmem>>, vector<8x32xf32>
      %c0_99 = arith.constant 0 : index
      %c0_100 = arith.constant 0 : index
      %c0_101 = arith.constant 0 : index
      %158 = vector.load %arg23[%c0_99, %c0_100, %c0_101] : memref<2x8x32xf32, #tpu.memory_space<vmem>>, vector<1x8x32xf32>
      %159 = vector.shape_cast %158 : vector<1x8x32xf32> to vector<8x32xf32>
      %160 = vector.shape_cast %157 : vector<8x32xf32> to vector<1x8x32xf32>
      tpu.vector_store %arg23[%c0_99, %c0_100, %c0_101], %160 {strides = array<i32>} : memref<2x8x32xf32, #tpu.memory_space<vmem>>, vector<1x8x32xf32>,
      %c8_102 = arith.constant 8 : index
      %c0_103 = arith.constant 0 : index
      %161 = vector.load %arg24[%c8_102, %c0_103] : memref<16x32xf32, #tpu.memory_space<vmem>>, vector<8x32xf32>
      %c1_104 = arith.constant 1 : index
      %c0_105 = arith.constant 0 : index
      %c0_106 = arith.constant 0 : index
      %162 = vector.load %arg23[%c1_104, %c0_105, %c0_106] : memref<2x8x32xf32, #tpu.memory_space<vmem>>, vector<1x8x32xf32>
      %163 = vector.shape_cast %162 : vector<1x8x32xf32> to vector<8x32xf32>
      %164 = vector.shape_cast %161 : vector<8x32xf32> to vector<1x8x32xf32>
      tpu.vector_store %arg23[%c1_104, %c0_105, %c0_106], %164 {strides = array<i32>} : memref<2x8x32xf32, #tpu.memory_space<vmem>>, vector<1x8x32xf32>,
    } else {
    }
    %c0 = arith.constant 0 : index
    %c0_1 = arith.constant 0 : index
    %3 = vector.load %arg24[%c0, %c0_1] : memref<16x32xf32, #tpu.memory_space<vmem>>, vector<16x32xf32>
    %c0_2 = arith.constant 0 : index
    %c0_3 = arith.constant 0 : index
    %c0_4 = arith.constant 0 : index
    %4 = vector.load %arg9[%c0_2, %c0_3, %c0_4] : memref<1x32x192xf32, #tpu.memory_space<vmem>>, vector<1x32x192xf32>
    %5 = vector.shape_cast %4 : vector<1x32x192xf32> to vector<32x192xf32>
    %cst = arith.constant dense<0.000000e+00> : vector<16x192xf32>
    %6 = tpu.matmul %3, %5, %cst {dimension_numbers = #tpu.dot_dimension_numbers<[1], [0], [0], [1], [0, 0, 1, 1], [], []>} : vector<16x32xf32>, vector<32x192xf32>, vector<16x192xf32> -> vector<16x192xf32>
    %c0_5 = arith.constant 0 : index
    %c0_6 = arith.constant 0 : index
    %7 = vector.load %arg8[%c0_5, %c0_6] : memref<16x16xf32, #tpu.memory_space<vmem>>, vector<16x16xf32>
    %cst_7 = arith.constant 0.000000e+00 : f32
    %8 = vector.broadcast %cst_7 : f32 to vector<16x32xf32>
    %9 = vector.extract_strided_slice %6 {offsets = [0, 0], sizes = [16, 32], strides = [1, 1]} : vector<16x192xf32> to vector<16x32xf32>
    %cst_8 = arith.constant 0.176776692 : f32
    %10 = vector.broadcast %cst_8 : f32 to vector<16x32xf32>
    %11 = arith.mulf %9, %10 : vector<16x32xf32>
    %12 = vector.extract_strided_slice %6 {offsets = [0, 64], sizes = [16, 32], strides = [1, 1]} : vector<16x192xf32> to vector<16x32xf32>
    %13 = vector.extract_strided_slice %6 {offsets = [0, 128], sizes = [16, 32], strides = [1, 1]} : vector<16x192xf32> to vector<16x32xf32>
    %cst_9 = arith.constant dense<0.000000e+00> : vector<16x16xf32>
    %14 = tpu.matmul %11, %12, %cst_9 {dimension_numbers = #tpu.dot_dimension_numbers<[1], [1], [0], [0], [0, 0, 1, 0], [], []>} : vector<16x32xf32>, vector<16x32xf32>, vector<16x16xf32> -> vector<16x16xf32>
    %15 = arith.addf %14, %7 : vector<16x16xf32>
    %cst_10 = arith.constant dense<0xFF800000> : vector<16xf32>
    %16 = vector.multi_reduction <maximumf>, %15, %cst_10 [1] : vector<16x16xf32> to vector<16xf32>
    %17 = vector.shape_cast %16 : vector<16xf32> to vector<16x1xf32>
    %18 = vector.broadcast %17 : vector<16x1xf32> to vector<16x16xf32>
    %19 = arith.subf %15, %18 : vector<16x16xf32>
    %20 = math.exp %19 : vector<16x16xf32>
    %cst_11 = arith.constant dense<0.000000e+00> : vector<16xf32>
    %21 = vector.multi_reduction <add>, %20, %cst_11 [1] : vector<16x16xf32> to vector<16xf32>
    %22 = vector.shape_cast %21 : vector<16xf32> to vector<16x1xf32>
    %23 = tpu.reciprocal %22 {approx = true} : vector<16x1xf32> -> vector<16x1xf32>
    %24 = vector.broadcast %23 : vector<16x1xf32> to vector<16x16xf32>
    %25 = arith.mulf %20, %24 : vector<16x16xf32>
    %cst_12 = arith.constant dense<0.000000e+00> : vector<16x32xf32>
    %26 = tpu.matmul %25, %13, %cst_12 {dimension_numbers = #tpu.dot_dimension_numbers<[1], [0], [0], [1], [0, 0, 1, 1], [], []>} : vector<16x16xf32>, vector<16x32xf32>, vector<16x32xf32> -> vector<16x32xf32>
    %c0_13 = arith.constant 0 : index
    %c0_14 = arith.constant 0 : index
    %c0_15 = arith.constant 0 : index
    %c0_16 = arith.constant 0 : index
    %27 = vector.load %arg10[%c0_13, %c0_14, %c0_15, %c0_16] : memref<1x2x32x32xf32, #tpu.memory_space<vmem>>, vector<1x1x32x32xf32>
    %28 = vector.shape_cast %27 : vector<1x1x32x32xf32> to vector<32x32xf32>
    %cst_17 = arith.constant dense<0.000000e+00> : vector<16x32xf32>
    %29 = tpu.matmul %26, %28, %cst_17 {dimension_numbers = #tpu.dot_dimension_numbers<[1], [0], [0], [1], [0, 0, 1, 1], [], []>} : vector<16x32xf32>, vector<32x32xf32>, vector<16x32xf32> -> vector<16x32xf32>
    %30 = arith.addf %8, %29 : vector<16x32xf32>
    %31 = vector.extract_strided_slice %6 {offsets = [0, 32], sizes = [16, 32], strides = [1, 1]} : vector<16x192xf32> to vector<16x32xf32>
    %cst_18 = arith.constant 0.176776692 : f32
    %32 = vector.broadcast %cst_18 : f32 to vector<16x32xf32>
    %33 = arith.mulf %31, %32 : vector<16x32xf32>
    %34 = vector.extract_strided_slice %6 {offsets = [0, 96], sizes = [16, 32], strides = [1, 1]} : vector<16x192xf32> to vector<16x32xf32>
    %35 = vector.extract_strided_slice %6 {offsets = [0, 160], sizes = [16, 32], strides = [1, 1]} : vector<16x192xf32> to vector<16x32xf32>
    %cst_19 = arith.constant dense<0.000000e+00> : vector<16x16xf32>
    %36 = tpu.matmul %33, %34, %cst_19 {dimension_numbers = #tpu.dot_dimension_numbers<[1], [1], [0], [0], [0, 0, 1, 0], [], []>} : vector<16x32xf32>, vector<16x32xf32>, vector<16x16xf32> -> vector<16x16xf32>
    %37 = arith.addf %36, %7 : vector<16x16xf32>
    %cst_20 = arith.constant dense<0xFF800000> : vector<16xf32>
    %38 = vector.multi_reduction <maximumf>, %37, %cst_20 [1] : vector<16x16xf32> to vector<16xf32>
    %39 = vector.shape_cast %38 : vector<16xf32> to vector<16x1xf32>
    %40 = vector.broadcast %39 : vector<16x1xf32> to vector<16x16xf32>
    %41 = arith.subf %37, %40 : vector<16x16xf32>
    %42 = math.exp %41 : vector<16x16xf32>
    %cst_21 = arith.constant dense<0.000000e+00> : vector<16xf32>
    %43 = vector.multi_reduction <add>, %42, %cst_21 [1] : vector<16x16xf32> to vector<16xf32>
    %44 = vector.shape_cast %43 : vector<16xf32> to vector<16x1xf32>
    %45 = tpu.reciprocal %44 {approx = true} : vector<16x1xf32> -> vector<16x1xf32>
    %46 = vector.broadcast %45 : vector<16x1xf32> to vector<16x16xf32>
    %47 = arith.mulf %42, %46 : vector<16x16xf32>
    %cst_22 = arith.constant dense<0.000000e+00> : vector<16x32xf32>
    %48 = tpu.matmul %47, %35, %cst_22 {dimension_numbers = #tpu.dot_dimension_numbers<[1], [0], [0], [1], [0, 0, 1, 1], [], []>} : vector<16x16xf32>, vector<16x32xf32>, vector<16x32xf32> -> vector<16x32xf32>
    %c0_23 = arith.constant 0 : index
    %c1 = arith.constant 1 : index
    %c0_24 = arith.constant 0 : index
    %c0_25 = arith.constant 0 : index
    %49 = vector.load %arg10[%c0_23, %c1, %c0_24, %c0_25] : memref<1x2x32x32xf32, #tpu.memory_space<vmem>>, vector<1x1x32x32xf32>
    %50 = vector.shape_cast %49 : vector<1x1x32x32xf32> to vector<32x32xf32>
    %cst_26 = arith.constant dense<0.000000e+00> : vector<16x32xf32>
    %51 = tpu.matmul %48, %50, %cst_26 {dimension_numbers = #tpu.dot_dimension_numbers<[1], [0], [0], [1], [0, 0, 1, 1], [], []>} : vector<16x32xf32>, vector<32x32xf32>, vector<16x32xf32> -> vector<16x32xf32>
    %52 = arith.addf %30, %51 : vector<16x32xf32>
    %c0_27 = arith.constant 0 : index
    %c0_28 = arith.constant 0 : index
    %c0_29 = arith.constant 0 : index
    %53 = vector.load %arg11[%c0_27, %c0_28, %c0_29] : memref<1x1x32xf32, #tpu.memory_space<vmem>>, vector<1x1x32xf32>
    %54 = vector.shape_cast %53 : vector<1x1x32xf32> to vector<1x32xf32>
    %55 = vector.broadcast %54 : vector<1x32xf32> to vector<16x32xf32>
    %56 = arith.addf %52, %55 : vector<16x32xf32>
    %57 = arith.addf %56, %3 : vector<16x32xf32>
    %c0_30 = arith.constant 0 : index
    %c0_31 = arith.constant 0 : index
    %c0_32 = arith.constant 0 : index
    %58 = vector.load %arg12[%c0_30, %c0_31, %c0_32] : memref<1x1x32xf32, #tpu.memory_space<vmem>>, vector<1x1x32xf32>
    %59 = vector.shape_cast %58 : vector<1x1x32xf32> to vector<1x32xf32>
    %c0_33 = arith.constant 0 : index
    %c0_34 = arith.constant 0 : index
    %c0_35 = arith.constant 0 : index
    %60 = vector.load %arg13[%c0_33, %c0_34, %c0_35] : memref<1x1x32xf32, #tpu.memory_space<vmem>>, vector<1x1x32xf32>
    %61 = vector.shape_cast %60 : vector<1x1x32xf32> to vector<1x32xf32>
    %cst_36 = arith.constant dense<0.000000e+00> : vector<16xf32>
    %62 = vector.multi_reduction <add>, %57, %cst_36 [1] : vector<16x32xf32> to vector<16xf32>
    %63 = vector.shape_cast %62 : vector<16xf32> to vector<16x1xf32>
    %cst_37 = arith.constant 3.200000e+01 : f32
    %64 = vector.broadcast %cst_37 : f32 to vector<16x1xf32>
    %65 = arith.divf %63, %64 : vector<16x1xf32>
    %66 = vector.broadcast %65 : vector<16x1xf32> to vector<16x32xf32>
    %67 = arith.subf %57, %66 : vector<16x32xf32>
    %68 = arith.mulf %67, %67 : vector<16x32xf32>
    %cst_38 = arith.constant dense<0.000000e+00> : vector<16xf32>
    %69 = vector.multi_reduction <add>, %68, %cst_38 [1] : vector<16x32xf32> to vector<16xf32>
    %70 = vector.shape_cast %69 : vector<16xf32> to vector<16x1xf32>
    %cst_39 = arith.constant 3.200000e+01 : f32
    %71 = vector.broadcast %cst_39 : f32 to vector<16x1xf32>
    %72 = arith.divf %70, %71 : vector<16x1xf32>
    %73 = vector.broadcast %65 : vector<16x1xf32> to vector<16x32xf32>
    %74 = arith.subf %57, %73 : vector<16x32xf32>
    %cst_40 = arith.constant 9.99999974E-6 : f32
    %75 = vector.broadcast %cst_40 : f32 to vector<16x1xf32>
    %76 = arith.addf %72, %75 : vector<16x1xf32>
    %77 = math.rsqrt %76 : vector<16x1xf32>
    %78 = vector.broadcast %77 : vector<16x1xf32> to vector<16x32xf32>
    %79 = arith.mulf %74, %78 : vector<16x32xf32>
    %80 = vector.broadcast %59 : vector<1x32xf32> to vector<16x32xf32>
    %81 = arith.mulf %79, %80 : vector<16x32xf32>
    %82 = vector.broadcast %61 : vector<1x32xf32> to vector<16x32xf32>
    %83 = arith.addf %81, %82 : vector<16x32xf32>
    %c0_41 = arith.constant 0 : index
    %c0_42 = arith.constant 0 : index
    %c0_43 = arith.constant 0 : index
    %84 = vector.load %arg14[%c0_41, %c0_42, %c0_43] : memref<1x32x128xf32, #tpu.memory_space<vmem>>, vector<1x32x128xf32>
    %85 = vector.shape_cast %84 : vector<1x32x128xf32> to vector<32x128xf32>
    %cst_44 = arith.constant dense<0.000000e+00> : vector<16x128xf32>
    %86 = tpu.matmul %83, %85, %cst_44 {dimension_numbers = #tpu.dot_dimension_numbers<[1], [0], [0], [1], [0, 0, 1, 1], [], []>} : vector<16x32xf32>, vector<32x128xf32>, vector<16x128xf32> -> vector<16x128xf32>
    %c0_45 = arith.constant 0 : index
    %c0_46 = arith.constant 0 : index
    %c0_47 = arith.constant 0 : index
    %87 = vector.load %arg15[%c0_45, %c0_46, %c0_47] : memref<1x1x128xf32, #tpu.memory_space<vmem>>, vector<1x1x128xf32>
    %88 = vector.shape_cast %87 : vector<1x1x128xf32> to vector<1x128xf32>
    %89 = vector.broadcast %88 : vector<1x128xf32> to vector<16x128xf32>
    %90 = arith.addf %86, %89 : vector<16x128xf32>
    %cst_48 = arith.constant 0.000000e+00 : f32
    %91 = vector.broadcast %cst_48 : f32 to vector<16x128xf32>
    %92 = arith.maximumf %90, %91 : vector<16x128xf32>
    %c0_49 = arith.constant 0 : index
    %c0_50 = arith.constant 0 : index
    %c0_51 = arith.constant 0 : index
    %93 = vector.load %arg16[%c0_49, %c0_50, %c0_51] : memref<1x128x32xf32, #tpu.memory_space<vmem>>, vector<1x128x32xf32>
    %94 = vector.shape_cast %93 : vector<1x128x32xf32> to vector<128x32xf32>
    %cst_52 = arith.constant dense<0.000000e+00> : vector<16x32xf32>
    %95 = tpu.matmul %92, %94, %cst_52 {dimension_numbers = #tpu.dot_dimension_numbers<[1], [0], [0], [1], [0, 0, 1, 1], [], []>} : vector<16x128xf32>, vector<128x32xf32>, vector<16x32xf32> -> vector<16x32xf32>
    %c0_53 = arith.constant 0 : index
    %c0_54 = arith.constant 0 : index
    %c0_55 = arith.constant 0 : index
    %96 = vector.load %arg17[%c0_53, %c0_54, %c0_55] : memref<1x1x32xf32, #tpu.memory_space<vmem>>, vector<1x1x32xf32>
    %97 = vector.shape_cast %96 : vector<1x1x32xf32> to vector<1x32xf32>
    %98 = vector.broadcast %97 : vector<1x32xf32> to vector<16x32xf32>
    %99 = arith.addf %95, %98 : vector<16x32xf32>
    %100 = arith.addf %99, %83 : vector<16x32xf32>
    %c0_56 = arith.constant 0 : index
    %c0_57 = arith.constant 0 : index
    %c0_58 = arith.constant 0 : index
    %101 = vector.load %arg18[%c0_56, %c0_57, %c0_58] : memref<1x1x32xf32, #tpu.memory_space<vmem>>, vector<1x1x32xf32>
    %102 = vector.shape_cast %101 : vector<1x1x32xf32> to vector<1x32xf32>
    %c0_59 = arith.constant 0 : index
    %c0_60 = arith.constant 0 : index
    %c0_61 = arith.constant 0 : index
    %103 = vector.load %arg19[%c0_59, %c0_60, %c0_61] : memref<1x1x32xf32, #tpu.memory_space<vmem>>, vector<1x1x32xf32>
    %104 = vector.shape_cast %103 : vector<1x1x32xf32> to vector<1x32xf32>
    %cst_62 = arith.constant dense<0.000000e+00> : vector<16xf32>
    %105 = vector.multi_reduction <add>, %100, %cst_62 [1] : vector<16x32xf32> to vector<16xf32>
    %106 = vector.shape_cast %105 : vector<16xf32> to vector<16x1xf32>
    %cst_63 = arith.constant 3.200000e+01 : f32
    %107 = vector.broadcast %cst_63 : f32 to vector<16x1xf32>
    %108 = arith.divf %106, %107 : vector<16x1xf32>
    %109 = vector.broadcast %108 : vector<16x1xf32> to vector<16x32xf32>
    %110 = arith.subf %100, %109 : vector<16x32xf32>
    %111 = arith.mulf %110, %110 : vector<16x32xf32>
    %cst_64 = arith.constant dense<0.000000e+00> : vector<16xf32>
    %112 = vector.multi_reduction <add>, %111, %cst_64 [1] : vector<16x32xf32> to vector<16xf32>
    %113 = vector.shape_cast %112 : vector<16xf32> to vector<16x1xf32>
    %cst_65 = arith.constant 3.200000e+01 : f32
    %114 = vector.broadcast %cst_65 : f32 to vector<16x1xf32>
    %115 = arith.divf %113, %114 : vector<16x1xf32>
    %116 = vector.broadcast %108 : vector<16x1xf32> to vector<16x32xf32>
    %117 = arith.subf %100, %116 : vector<16x32xf32>
    %cst_66 = arith.constant 9.99999974E-6 : f32
    %118 = vector.broadcast %cst_66 : f32 to vector<16x1xf32>
    %119 = arith.addf %115, %118 : vector<16x1xf32>
    %120 = math.rsqrt %119 : vector<16x1xf32>
    %121 = vector.broadcast %120 : vector<16x1xf32> to vector<16x32xf32>
    %122 = arith.mulf %117, %121 : vector<16x32xf32>
    %123 = vector.broadcast %102 : vector<1x32xf32> to vector<16x32xf32>
    %124 = arith.mulf %122, %123 : vector<16x32xf32>
    %125 = vector.broadcast %104 : vector<1x32xf32> to vector<16x32xf32>
    %126 = arith.addf %124, %125 : vector<16x32xf32>
    %c0_67 = arith.constant 0 : index
    %c0_68 = arith.constant 0 : index
    %127 = vector.load %arg24[%c0_67, %c0_68] : memref<16x32xf32, #tpu.memory_space<vmem>>, vector<16x32xf32>
    tpu.vector_store %arg24[%c0_67, %c0_68], %126 {strides = array<i32>} : memref<16x32xf32, #tpu.memory_space<vmem>>, vector<16x32xf32>,
    %c1_i32 = arith.constant 1 : i32
    %128 = arith.cmpi eq, %arg0, %c1_i32 : i32
    %129 = arith.extui %128 : i1 to i32
    %c0_i32_69 = arith.constant 0 : i32
    %130 = arith.cmpi ne, %129, %c0_i32_69 : i32
    scf.if %130 {
      %c0_70 = arith.constant 0 : index
      %c0_71 = arith.constant 0 : index
      %131 = vector.load %arg20[%c0_70, %c0_71] : memref<32x8xf32, #tpu.memory_space<vmem>>, vector<32x8xf32>
      %cst_72 = arith.constant dense<0.000000e+00> : vector<16x8xf32>
      %132 = tpu.matmul %126, %131, %cst_72 {dimension_numbers = #tpu.dot_dimension_numbers<[1], [0], [0], [1], [0, 0, 1, 1], [], []>} : vector<16x32xf32>, vector<32x8xf32>, vector<16x8xf32> -> vector<16x8xf32>
      %c0_73 = arith.constant 0 : index
      %c0_74 = arith.constant 0 : index
      %133 = vector.load %arg21[%c0_73, %c0_74] : memref<1x8xf32, #tpu.memory_space<vmem>>, vector<1x8xf32>
      %134 = vector.broadcast %133 : vector<1x8xf32> to vector<16x8xf32>
      %135 = arith.addf %132, %134 : vector<16x8xf32>
      %c0_75 = arith.constant 0 : index
      %c0_76 = arith.constant 0 : index
      %136 = vector.load %arg22[%c0_75, %c0_76] : memref<16x8xf32, #tpu.memory_space<vmem>>, vector<16x8xf32>
      tpu.vector_store %arg22[%c0_75, %c0_76], %135 {strides = array<i32>} : memref<16x8xf32, #tpu.memory_space<vmem>>, vector<16x8xf32>,
    } else {
    }
    return
  }
  func.func @transform_0(%arg0: i32) -> (i32, i32) {
    %c0_i32 = arith.constant 0 : i32
    %c0_i32_0 = arith.constant 0 : i32
    %c0_i32_1 = arith.constant 0 : i32
    return %c0_i32, %c0_i32_0 : i32, i32
  }
  func.func @transform_1(%arg0: i32) -> (i32, i32, i32) {
    %c0_i32 = arith.constant 0 : i32
    %c0_i32_0 = arith.constant 0 : i32
    %c0_i32_1 = arith.constant 0 : i32
    %c0_i32_2 = arith.constant 0 : i32
    return %c0_i32, %c0_i32_0, %c0_i32_1 : i32, i32, i32
  }
  func.func @transform_2(%arg0: i32) -> (i32, i32) {
    %c0_i32 = arith.constant 0 : i32
    %c0_i32_0 = arith.constant 0 : i32
    %c0_i32_1 = arith.constant 0 : i32
    return %c0_i32, %c0_i32_0 : i32, i32
  }
  func.func @transform_3(%arg0: i32) -> (i32, i32) {
    %c0_i32 = arith.constant 0 : i32
    %c0_i32_0 = arith.constant 0 : i32
    %c0_i32_1 = arith.constant 0 : i32
    return %c0_i32, %c0_i32_0 : i32, i32
  }
  func.func @transform_4(%arg0: i32) -> (i32, i32) {
    %c0_i32 = arith.constant 0 : i32
    %c0_i32_0 = arith.constant 0 : i32
    %c0_i32_1 = arith.constant 0 : i32
    return %c0_i32, %c0_i32_0 : i32, i32
  }
  func.func @transform_5(%arg0: i32) -> (i32, i32) {
    %c0_i32 = arith.constant 0 : i32
    %c0_i32_0 = arith.constant 0 : i32
    %c0_i32_1 = arith.constant 0 : i32
    return %c0_i32, %c0_i32_0 : i32, i32
  }
  func.func @transform_6(%arg0: i32) -> (i32, i32) {
    %c0_i32 = arith.constant 0 : i32
    %c0_i32_0 = arith.constant 0 : i32
    %c0_i32_1 = arith.constant 0 : i32
    return %c0_i32, %c0_i32_0 : i32, i32
  }
  func.func @transform_7(%arg0: i32) -> (i32, i32) {
    %c0_i32 = arith.constant 0 : i32
    %c0_i32_0 = arith.constant 0 : i32
    %c0_i32_1 = arith.constant 0 : i32
    return %c0_i32, %c0_i32_0 : i32, i32
  }
  func.func @transform_8(%arg0: i32) -> (i32, i32, i32) {
    %c0_i32 = arith.constant 0 : i32
    %c0_i32_0 = arith.constant 0 : i32
    %c0_i32_1 = arith.constant 0 : i32
    return %arg0, %c0_i32, %c0_i32_0 : i32, i32, i32
  }
  func.func @transform_9(%arg0: i32) -> (i32, i32, i32, i32) {
    %c0_i32 = arith.constant 0 : i32
    %c0_i32_0 = arith.constant 0 : i32
    %c0_i32_1 = arith.constant 0 : i32
    %c0_i32_2 = arith.constant 0 : i32
    return %arg0, %c0_i32, %c0_i32_0, %c0_i32_1 : i32, i32, i32, i32
  }
  func.func @transform_10(%arg0: i32) -> (i32, i32, i32) {
    %c0_i32 = arith.constant 0 : i32
    %c0_i32_0 = arith.constant 0 : i32
    %c0_i32_1 = arith.constant 0 : i32
    return %arg0, %c0_i32, %c0_i32_0 : i32, i32, i32
  }
  func.func @transform_11(%arg0: i32) -> (i32, i32, i32) {
    %c0_i32 = arith.constant 0 : i32
    %c0_i32_0 = arith.constant 0 : i32
    %c0_i32_1 = arith.constant 0 : i32
    return %arg0, %c0_i32, %c0_i32_0 : i32, i32, i32
  }
  func.func @transform_12(%arg0: i32) -> (i32, i32, i32) {
    %c0_i32 = arith.constant 0 : i32
    %c0_i32_0 = arith.constant 0 : i32
    %c0_i32_1 = arith.constant 0 : i32
    return %arg0, %c0_i32, %c0_i32_0 : i32, i32, i32
  }
  func.func @transform_13(%arg0: i32) -> (i32, i32, i32) {
    %c0_i32 = arith.constant 0 : i32
    %c0_i32_0 = arith.constant 0 : i32
    %c0_i32_1 = arith.constant 0 : i32
    return %arg0, %c0_i32, %c0_i32_0 : i32, i32, i32
  }
  func.func @transform_14(%arg0: i32) -> (i32, i32, i32) {
    %c0_i32 = arith.constant 0 : i32
    %c0_i32_0 = arith.constant 0 : i32
    %c0_i32_1 = arith.constant 0 : i32
    return %arg0, %c0_i32, %c0_i32_0 : i32, i32, i32
  }
  func.func @transform_15(%arg0: i32) -> (i32, i32, i32) {
    %c0_i32 = arith.constant 0 : i32
    %c0_i32_0 = arith.constant 0 : i32
    %c0_i32_1 = arith.constant 0 : i32
    return %arg0, %c0_i32, %c0_i32_0 : i32, i32, i32
  }
  func.func @transform_16(%arg0: i32) -> (i32, i32, i32) {
    %c0_i32 = arith.constant 0 : i32
    %c0_i32_0 = arith.constant 0 : i32
    %c0_i32_1 = arith.constant 0 : i32
    return %arg0, %c0_i32, %c0_i32_0 : i32, i32, i32
  }
  func.func @transform_17(%arg0: i32) -> (i32, i32, i32) {
    %c0_i32 = arith.constant 0 : i32
    %c0_i32_0 = arith.constant 0 : i32
    %c0_i32_1 = arith.constant 0 : i32
    return %arg0, %c0_i32, %c0_i32_0 : i32, i32, i32
  }
  func.func @transform_18(%arg0: i32) -> (i32, i32, i32) {
    %c0_i32 = arith.constant 0 : i32
    %c0_i32_0 = arith.constant 0 : i32
    %c0_i32_1 = arith.constant 0 : i32
    return %arg0, %c0_i32, %c0_i32_0 : i32, i32, i32
  }
  func.func @transform_19(%arg0: i32) -> (i32, i32) {
    %c0_i32 = arith.constant 0 : i32
    %c0_i32_0 = arith.constant 0 : i32
    %c0_i32_1 = arith.constant 0 : i32
    return %c0_i32, %c0_i32_0 : i32, i32
  }
  func.func @transform_20(%arg0: i32) -> (i32, i32) {
    %c0_i32 = arith.constant 0 : i32
    %c0_i32_0 = arith.constant 0 : i32
    %c0_i32_1 = arith.constant 0 : i32
    return %c0_i32, %c0_i32_0 : i32, i32
  }
  func.func @transform_21(%arg0: i32) -> (i32, i32) {
    %c0_i32 = arith.constant 0 : i32
    %c0_i32_0 = arith.constant 0 : i32
    %c0_i32_1 = arith.constant 0 : i32
    return %c0_i32, %c0_i32_0 : i32, i32
  }
  func.func @transform_22(%arg0: i32) -> (i32, i32, i32) {
    %c0_i32 = arith.constant 0 : i32
    %c0_i32_0 = arith.constant 0 : i32
    %c0_i32_1 = arith.constant 0 : i32
    %c0_i32_2 = arith.constant 0 : i32
    return %c0_i32, %c0_i32_0, %c0_i32_1 : i32, i32, i32
  }
}

</mosaic_0001>

<bundles_post_ra>
// kernel: tpu_custom_call.1
= control target key start
LH: loop header
LB: loop body
LE: loop exit
PB: predicated region body
PF: predicated region fallthrough
CT: control target
= control target key end

     0   :  { %s4259_s0 = inlined_call_operand.vmem [shape: f32[12,16], index: 0, kind: input, shape index: {}]   ;;  %s4260_s1 = inlined_call_operand.hbm [shape: f32[2,1,32], index: 1, kind: input, shape index: {}]   ;;  %s4261_s2 = inlined_call_operand.hbm [shape: f32[2,8], index: 2, kind: input, shape index: {}]   ;;  %s4262_s3 = inlined_call_operand.vmem [shape: f32[16,32], index: 3, kind: input, shape index: {}]   ;;  %s4263_s4 = inlined_call_operand.hbm [shape: f32[1,32], index: 4, kind: input, shape index: {}]   ;;  %s4264_s5 = inlined_call_operand.hbm [shape: f32[8,32], index: 5, kind: input, shape index: {}]   ;;  %s4265_s6 = inlined_call_operand.hbm [shape: f32[1,32], index: 6, kind: input, shape index: {}]   ;;  %s4266_s7 = inlined_call_operand.hbm [shape: f32[16,16], index: 7, kind: input, shape index: {}]   ;;  %s4267_s8 = inlined_call_operand.vmem [shape: f32[2,32,192], index: 8, kind: input, shape index: {}]   ;;  %s4268_s9 = inlined_call_operand.vmem [shape: f32[2,2,32,32], index: 9, kind: input, shape index: {}]   ;;  %s4269_s10 = inlined_call_operand.hbm [shape: f32[2,1,32], index: 10, kind: input, shape index: {}]   ;;  %s4270_s11 = inlined_call_operand.hbm [shape: f32[2,1,32], index: 11, kind: input, shape index: {}]   ;;  %s4271_s12 = inlined_call_operand.hbm [shape: f32[2,1,32], index: 12, kind: input, shape index: {}]   ;;  %s4272_s13 = inlined_call_operand.vmem [shape: f32[2,32,128], index: 13, kind: input, shape index: {}]   ;;  %s4273_s14 = inlined_call_operand.hbm [shape: f32[2,1,128], index: 14, kind: input, shape index: {}]   ;;  %s4274_s15 = inlined_call_operand.vmem [shape: f32[2,128,32], index: 15, kind: input, shape index: {}]   ;;  %s4275_s16 = inlined_call_operand.hbm [shape: f32[2,1,32], index: 16, kind: input, shape index: {}]   ;;  %s4276_s17 = inlined_call_operand.hbm [shape: f32[2,1,32], index: 17, kind: input, shape index: {}]   ;;  %s4277_s18 = inlined_call_operand.vmem [shape: f32[2,1,32], index: 18, kind: input, shape index: {}]   ;;  %s4278_s19 = inlined_call_operand.vmem [shape: f32[32,8], index: 19, kind: input, shape index: {}]   ;;  %s4279_s20 = inlined_call_operand.vmem [shape: f32[1,8], index: 20, kind: input, shape index: {}]   ;;  %s4280_s21 = inlined_call_operand.vmem [shape: f32[16,8], index: 21, kind: output, shape index: {0}]   ;;  %s4281_s22 = inlined_call_operand.hbm [shape: f32[2,8,32], index: 22, kind: output, shape index: {1}]  }
   0x1   :  { %4311 = sst [smem:[#allocation30_spill]] %s4259_s0 }
   0x2   :  { %4312 = sst [smem:[#allocation31_spill]] %s4260_s1 }
   0x3   :  { %4313 = sst [smem:[#allocation32_spill]] %s4261_s2 }
   0x4   :  { %4314 = sst [smem:[#allocation33_spill]] %s4262_s3 }
   0x5   :  { %4315 = sst [smem:[#allocation34_spill]] %s4263_s4 }
   0x6   :  { %4316 = sst [smem:[#allocation35_spill]] %s4264_s5 }
   0x7   :  { %4317 = sst [smem:[#allocation36_spill]] %s4265_s6 }
   0x8   :  { %4318 = sst [smem:[#allocation37_spill]] %s4266_s7 }
   0x9   :  { %4319 = sst [smem:[#allocation38_spill]] %s4269_s10 }
   0xa   :  { %4320 = sst [smem:[#allocation39_spill]] %s4270_s11 }
   0xb   :  { %4321 = sst [smem:[#allocation40_spill]] %s4271_s12 }
   0xc   :  { %4322 = sst [smem:[#allocation41_spill]] %s4272_s13 }
   0xd   :  { %4323 = sst [smem:[#allocation42_spill]] %s4273_s14 }
   0xe   :  { %4324 = sst [smem:[#allocation43_spill]] %s4274_s15 }
   0xf   :  { %4325 = sst [smem:[#allocation44_spill]] %s4275_s16 }
  0x10   :  { %4326 = sst [smem:[#allocation45_spill]] %s4277_s18 }
  0x11   :  { %4327 = sst [smem:[#allocation46_spill]] %s4278_s19 }
  0x12   :  { %4328 = sst [smem:[#allocation47_spill]] %s4279_s20 }
  0x13   :  { %4329 = sst [smem:[#allocation48_spill]] %s4280_s21 }
  0x14   :  { %4330 = sst [smem:[#allocation49_spill]] %s4281_s22 }
  0x15   :  { %28 = vsyncpa [#allocation4], 0 }
  0x16   :  { %29 = vsyncpa [#allocation7], 0 }
  0x17   :  { %30 = vsyncpa [#allocation10], 0 }
  0x18   :  { %31 = vsyncpa [#allocation13], 0 }
  0x19   :  { %32 = vsyncpa [#allocation5], 0  ;;  %s3644_s3 = smov 0   ;;  %s3646_s28 = smov 0  }
  0x1a   :  { %s3648_s29 = smov 0   ;;  %s3650_s30 = smov 0  }
  0x1b LB: > { %4331 = sst [smem:[#allocation27_spill]] %s3498_s29  ;;  %s3504_s4 = smov [#allocation3]   ;;  %s3502_s30 = sphi %s3650_s30, %s4389_s30   ;;  %s3498_s29 = sphi %s3648_s29, %s4391_s29   ;;  %s3494_s28 = sphi %s3646_s28, %s4393_s28   ;;  %s3490_s3 = sphi %s3644_s3, %s4392_s3  }
  0x1c   : > { %s596_s0 = sshll.u32 %s3504_s4, 4  ;;  %s3665_s23 = sadd.s32 4294967295, %s3502_s30   ;;  %s597_s0 = int_to_ptr.vmem [resolvable:$true] %s596_s0 }
  0x1d   : > { %p2532_p0 = scmp.ge.s32.totalorder %s3502_s30, 1  ;;  %p4291_p1 = scmp.eq.s32.totalorder %s3665_s23, 0 }
  0x1e   : > { %p581_p2 = scmp.lt.s32.totalorder %s3502_s30, 3  ;;  %s3684_s24 = sadd.s32 1, %s3502_s30  }
  0x1f   : > { %4334 = sst [smem:[#allocation28_spill]] %s3684_s24  ;;  %s4335_s26 = sld [smem:[#allocation31_spill]] }
  0x20   : > { %p3671_p4 = pnand %p2532_p0, %p581_p2 }
  0x22   : > { %s4332_s1 = scalar_select %p3671_p4, 1, 0 }
  0x23   : > { %p2931_p5 = pneg %p3671_p4 }
  0x25   : > { %p3679_p6 = pnand %p2931_p5, %p4291_p1  ;;  %s3074_s2 = scalar_lea.hbm %s4335_s26, 32 }
  0x26   : > { %p3075_p7 = scmp.ne.s32.totalorder %s4335_s26, %s3074_s2  ;;  %p3081_p11 = scmp.lt.u32.totalorder %s3074_s2, %s4335_s26 }
  0x27   : > { %s4333_s5 = scalar_select %p3679_p6, 1, 0 }
  0x28   : > { %p3694_p8 = pneg %p3679_p6 }
  0x2a   : > { %s4336_s22 = scalar_select %p3694_p8, 1, 0 }
  0x2b   : > { %p3077_p9 = pnand %p3694_p8, %p3075_p7 }
  0x2d   : > { %p3078_p10 = pneg %p3077_p9 }
  0x2f   : > { %p3083_p12 = pnand %p3081_p11, %p3078_p10 }
  0x31   : > { %3086 = shalt.err (!%p3083_p12)
}
  0x32   : > { %s3087_s6 = scalar_lea.vmem %s597_s0, 32  ;;  %p3095_p5 = scmp.lt.s32.totalorder %s597_s0, %s597_s0 }
  0x33   : > { %p3088_p13 = scmp.ne.s32.totalorder %s597_s0, %s3087_s6  ;;  %p3096_p3 = scmp.lt.s32.totalorder %s3087_s6, %s3087_s6 }
  0x35   : > { %p3090_p0 = pnand %p3088_p13, %p3694_p8  ;;  %p3097_p1 = por %p3096_p3, %p3095_p5 }
  0x37   : > { %p3091_p2 = pneg %p3090_p0 }
  0x39   : > { %p3098_p4 = pnand %p3097_p1, %p3091_p2 }
  0x3b   : > { %3101 = shalt.err (!%p3098_p4)
}
  0x3c   : > { %s3505_s25 = smov 16   ;;  %s3506_s20 = smov 1  }
  0x3d   : > { %2934 = dma.hbm_to_vmem [thread:$0]  (!%p3679_p6), %s4335_s26, 32, %s597_s0, [#allocation4], %s3505_s25, %s3505_s25, %s3506_s20  }
  0x3e   : > { %s262_s27 = ssub.s32 %s3502_s30, %s3684_s24  ;;  %s265_s4 = sadd.s32 1, %s3498_s29 }
  0x3f   : > { %p263_p1 = scmp.eq.s32.totalorder %s262_s27, 0  ;;  %p272_p3 = scmp.ne.s32.totalorder %s3498_s29, %s3494_s28 }
  0x40   : > { %p273_p4 = scmp.eq.s32.totalorder %s3502_s30, 0  ;;  %p278_p7 = scmp.ne.s32.totalorder %s3494_s28, %s3490_s3 }
  0x41   : > { %s3719_s6 = scalar_select %p263_p1, %s3498_s29, %s265_s4  }
  0x42   : > { %p274_p9 = por %p273_p4, %p272_p3  ;;  %p4338_p10 = scmp.eq.s32.totalorder %s3665_s23, 0 }
  0x43   : > { %4337 = sst [smem:[#allocation29_spill]] %s3719_s6  ;;  %p2975_p12 = scmp.lt.s32.totalorder %s3502_s30, 2 }
  0x44   : > { %p3723_p11 = por %p4338_p10, %p278_p7  ;;  %s692_s18 = sand.u32 1, %s3502_s30  }
  0x45   : > { %s3730_s15 = sand.u32 1, %s3498_s29   ;;  %s3733_s0 = sshll.u32 %s3502_s30, 4 }
  0x46   : > { %s4339_s19 = scalar_select %p3723_p11, 1, 0 }
  0x47   : > { %s4340_s10 = sld [smem:[#allocation38_spill]]  ;;  %s695_s21 = scalar_lea.vmem [#allocation14], %s3730_s15 }
  0x48   : > { %s702_s2 = sshll.u32 %s695_s21, 4  ;;  %p3744_p13 = pnand %p2975_p12, %p274_p9  ;;  %s3742_s2 = int_to_ptr.vmem [resolvable:$true] %s702_s2 }
  0x49   : > { %s4342_s11 = sld [smem:[#allocation39_spill]]  ;;  %s712_s20 = scalar_lea.vmem [#allocation15], %s3730_s15 }
  0x4a   : > { %s4341_s27 = scalar_select %p3744_p13, 1, 0 }
  0x4b   : > { %s3755_s26 = sshll.u32 %s712_s20, 4  ;;  %s3757_s6 = scalar_lea.sflag [#allocation4], %s692_s18  ;;  %s720_s26 = int_to_ptr.vmem [resolvable:$true] %s3755_s26 }
  0x4c   : > { %p3763_p2 = pneg %p3744_p13 }
  0x4d   : > { %s3739_s3 = scalar_lea.hbm %s4340_s10, %s3733_s0  ;;  %s3107_s24 = scalar_lea.hbm %s4340_s10, 32 }
  0x4e   : > { %s3102_s29 = scalar_lea.hbm %s3739_s3, 16  ;;  %p3108_p3 = scmp.lt.u32.totalorder %s3739_s3, %s4340_s10 }
  0x4f   : > { %s3752_s25 = scalar_lea.hbm %s4342_s11, %s3733_s0  ;;  %p3103_p0 = scmp.ne.s32.totalorder %s3739_s3, %s3102_s29 }
  0x50   : > { %s4343_s21 = scalar_select %p3763_p2, 1, 0 }
  0x51   : > { %p3105_p5 = pnand %p3763_p2, %p3103_p0  ;;  %p3109_p4 = scmp.lt.u32.totalorder %s3107_s24, %s3102_s29 }
  0x52   : > { %p3111_p9 = scmp.lt.u32.totalorder %s3102_s29, %s3739_s3 }
  0x53   : > { %p3106_p1 = pneg %p3105_p5  ;;  %p3110_p7 = por %p3109_p4, %p3108_p3 }
  0x55   : > { %p3112_p10 = por %p3111_p9, %p3110_p7 }
  0x57   : > { %p3113_p12 = pnand %p3112_p10, %p3106_p1 }
  0x59   : > { %3116 = shalt.err (!%p3113_p12)
}
  0x5a   : > { %s3117_s18 = scalar_lea.vmem %s3742_s2, 16  ;;  %s3507_s30 = smov [#allocation14]  }
  0x5b   : > { %p3118_p0 = scmp.ne.s32.totalorder %s3742_s2, %s3117_s18  ;;  %s3122_s4 = sshll.u32 %s3507_s30, 4  ;;  %s3123_s4 = int_to_ptr.vmem [resolvable:$false] %s3122_s4 }
  0x5c   : > { %s3124_s13 = scalar_lea.vmem %s3123_s4, 32  ;;  %p3125_p6 = scmp.lt.s32.totalorder %s3742_s2, %s3123_s4 }
  0x5d   : > { %p3120_p5 = pnand %p3118_p0, %p3763_p2  ;;  %p3126_p8 = scmp.lt.s32.totalorder %s3124_s13, %s3117_s18 }
  0x5f   : > { %p3121_p11 = pneg %p3120_p5  ;;  %p3127_p3 = por %p3126_p8, %p3125_p6 }
  0x61   : > { %p3128_p4 = pnand %p3127_p3, %p3121_p11 }
  0x63   : > { %3131 = shalt.err (!%p3128_p4)
}
  0x64   : > { %2953 = dma.hbm_to_vmem [thread:$0]  (!%p3744_p13), %s3739_s3, 16, %s3742_s2, %s3757_s6  }
  0x65   : > { %s3132_s29 = scalar_lea.hbm %s3752_s25, 16  ;;  %s3137_s18 = scalar_lea.hbm %s4342_s11, 32 }
  0x66   : > { %p3133_p1 = scmp.ne.s32.totalorder %s3752_s25, %s3132_s29  ;;  %p3138_p8 = scmp.lt.u32.totalorder %s3752_s25, %s4342_s11 }
  0x67   : > { %p3139_p11 = scmp.lt.u32.totalorder %s3137_s18, %s3132_s29  ;;  %p3141_p10 = scmp.lt.u32.totalorder %s3132_s29, %s3752_s25 }
  0x68   : > { %p3135_p7 = pnand %p3133_p1, %p3763_p2 }
  0x69   : > { %p3140_p9 = por %p3139_p11, %p3138_p8 }
  0x6a   : > { %p3136_p6 = pneg %p3135_p7 }
  0x6b   : > { %p3142_p12 = por %p3141_p10, %p3140_p9 }
  0x6d   : > { %p3143_p0 = pnand %p3142_p12, %p3136_p6 }
  0x6f   : > { %3146 = shalt.err (!%p3143_p0)
}
  0x70   : > { %s3147_s3 = scalar_lea.vmem %s720_s26, 16  ;;  %s3508_s2 = smov [#allocation15]  }
  0x71   : > { %p3148_p5 = scmp.ne.s32.totalorder %s720_s26, %s3147_s3  ;;  %s3152_s13 = sshll.u32 %s3508_s2, 4  ;;  %s3153_s13 = int_to_ptr.vmem [resolvable:$false] %s3152_s13 }
  0x72   : > { %s3154_s24 = scalar_lea.vmem %s3153_s13, 32  ;;  %p3155_p1 = scmp.lt.s32.totalorder %s720_s26, %s3153_s13 }
  0x73   : > { %p3150_p3 = pnand %p3148_p5, %p3763_p2  ;;  %p3156_p7 = scmp.lt.s32.totalorder %s3154_s24, %s3147_s3 }
  0x75   : > { %p3151_p4 = pneg %p3150_p3  ;;  %p3157_p13 = por %p3156_p7, %p3155_p1 }
  0x77   : > { %p3158_p8 = pnand %p3157_p13, %p3151_p4 }
  0x79   : > { %3161 = shalt.err (!%p3158_p8)
}
  0x7a   : > { %p4344_p11 = scmp.ne.s32.totalorder %s4341_s27, 0  ;;  %s4345_s12 = sld [smem:[#allocation40_spill]] }
  0x7b   : > { %s729_s30 = scalar_lea.vmem [#allocation16], %s3730_s15 }
  0x7c   : > { %2956 = dma.hbm_to_vmem [thread:$0]  (!%p4344_p11), %s3752_s25, 16, %s720_s26, %s3757_s6  }
  0x7d   : > { %s736_s4 = sshll.u32 %s729_s30, 4  ;;  %s737_s4 = int_to_ptr.vmem [resolvable:$true] %s736_s4 }
  0x80   : > { %s3810_s18 = scalar_lea.hbm %s4345_s12, %s3733_s0  ;;  %s3167_s26 = scalar_lea.hbm %s4345_s12, 32 }
  0x81   : > { %s3162_s3 = scalar_lea.hbm %s3810_s18, 16  ;;  %p3168_p10 = scmp.lt.u32.totalorder %s3810_s18, %s4345_s12 }
  0x82   : > { %p3163_p13 = scmp.ne.s32.totalorder %s3810_s18, %s3162_s3  ;;  %p3169_p12 = scmp.lt.u32.totalorder %s3167_s26, %s3162_s3 }
  0x83   : > { %p3171_p5 = scmp.lt.u32.totalorder %s3162_s3, %s3810_s18 }
  0x84   : > { %p3165_p6 = pnand %p3163_p13, %p3763_p2  ;;  %p3170_p0 = por %p3169_p12, %p3168_p10 }
  0x86   : > { %p3166_p9 = pneg %p3165_p6  ;;  %p3172_p3 = por %p3171_p5, %p3170_p0 }
  0x88   : > { %p3173_p4 = pnand %p3172_p3, %p3166_p9 }
  0x8a   : > { %3176 = shalt.err (!%p3173_p4)
}
  0x8b   : > { %s3177_s29 = scalar_lea.vmem %s737_s4, 16  ;;  %s3509_s20 = smov [#allocation16]  }
  0x8c   : > { %p3178_p1 = scmp.ne.s32.totalorder %s737_s4, %s3177_s29  ;;  %s3182_s30 = sshll.u32 %s3509_s20, 4  ;;  %s3183_s30 = int_to_ptr.vmem [resolvable:$false] %s3182_s30 }
  0x8d   : > { %s3184_s2 = scalar_lea.vmem %s3183_s30, 32  ;;  %p3185_p13 = scmp.lt.s32.totalorder %s737_s4, %s3183_s30 }
  0x8e   : > { %p3180_p7 = pnand %p3178_p1, %p3763_p2  ;;  %p3186_p6 = scmp.lt.s32.totalorder %s3184_s2, %s3177_s29 }
  0x90   : > { %p3181_p8 = pneg %p3180_p7  ;;  %p3187_p11 = por %p3186_p6, %p3185_p13 }
  0x92   : > { %p3188_p10 = pnand %p3187_p11, %p3181_p8 }
  0x94   : > { %3191 = shalt.err (!%p3188_p10)
}
  0x95   : > { %p4346_p12 = scmp.ne.s32.totalorder %s4341_s27, 0  ;;  %s4347_s14 = sld [smem:[#allocation42_spill]] }
  0x96   : > { %s754_s25 = scalar_lea.vmem [#allocation17], %s3730_s15 }
  0x97   : > { %2959 = dma.hbm_to_vmem [thread:$0]  (!%p4346_p12), %s3810_s18, 16, %s737_s4, %s3757_s6  }
  0x98   : > { %s761_s24 = sshll.u32 %s754_s25, 4  ;;  %s762_s24 = int_to_ptr.vmem [resolvable:$true] %s761_s24 }
  0x9b   : > { %s3835_s26 = scalar_lea.hbm %s4347_s14, %s3733_s0  ;;  %s3197_s18 = scalar_lea.hbm %s4347_s14, 32 }
  0x9c   : > { %s3192_s29 = scalar_lea.hbm %s3835_s26, 16  ;;  %p3198_p5 = scmp.lt.u32.totalorder %s3835_s26, %s4347_s14 }
  0x9d   : > { %p3193_p11 = scmp.ne.s32.totalorder %s3835_s26, %s3192_s29  ;;  %p3199_p3 = scmp.lt.u32.totalorder %s3197_s18, %s3192_s29 }
  0x9e   : > { %p3201_p1 = scmp.lt.u32.totalorder %s3192_s29, %s3835_s26 }
  0x9f   : > { %p3195_p9 = pnand %p3193_p11, %p3763_p2  ;;  %p3200_p4 = por %p3199_p3, %p3198_p5 }
  0xa1   : > { %p3196_p0 = pneg %p3195_p9  ;;  %p3202_p7 = por %p3201_p1, %p3200_p4 }
  0xa3   : > { %p3203_p8 = pnand %p3202_p7, %p3196_p0 }
  0xa5   : > { %3206 = shalt.err (!%p3203_p8)
}
  0xa6   : > { %s3207_s3 = scalar_lea.vmem %s762_s24, 16  ;;  %s3510_s13 = smov [#allocation17]  }
  0xa7   : > { %p3208_p13 = scmp.ne.s32.totalorder %s762_s24, %s3207_s3  ;;  %s3212_s25 = sshll.u32 %s3510_s13, 4  ;;  %s3213_s25 = int_to_ptr.vmem [resolvable:$false] %s3212_s25 }
  0xa8   : > { %s3214_s20 = scalar_lea.vmem %s3213_s25, 32  ;;  %p3215_p11 = scmp.lt.s32.totalorder %s762_s24, %s3213_s25 }
  0xa9   : > { %p3210_p6 = pnand %p3208_p13, %p3763_p2  ;;  %p3216_p9 = scmp.lt.s32.totalorder %s3214_s20, %s3207_s3 }
  0xab   : > { %p3211_p10 = pneg %p3210_p6  ;;  %p3217_p12 = por %p3216_p9, %p3215_p11 }
  0xad   : > { %p3218_p3 = pnand %p3217_p12, %p3211_p10 }
  0xaf   : > { %3221 = shalt.err (!%p3218_p3)
}
  0xb0   : > { %p4348_p5 = scmp.ne.s32.totalorder %s4341_s27, 0  ;;  %s3511_s29 = smov [#allocation6]  }
  0xb1   : > { %s610_s30 = sshll.u32 %s3511_s29, 4  ;;  %s3512_s18 = smov [#allocation9]   ;;  %s611_s30 = int_to_ptr.vmem [resolvable:$true] %s610_s30 }
  0xb2   : > { %2962 = dma.hbm_to_vmem [thread:$0]  (!%p4348_p5), %s3835_s26, 16, %s762_s24, %s3757_s6  }
  0xb3   : > { %s635_s4 = sshll.u32 %s3512_s18, 4  ;;  %s4349_s10 = sld [smem:[#allocation32_spill]]  ;;  %s636_s4 = int_to_ptr.vmem [resolvable:$true] %s635_s4 }
  0xb4   : > { %p4350_p0 = scmp.ne.s32.totalorder %s4336_s22, 0 }
  0xb9   : > { %s3222_s11 = scalar_lea.hbm %s4349_s10, 32 }
  0xba   : > { %p3223_p12 = scmp.ne.s32.totalorder %s4349_s10, %s3222_s11  ;;  %p3229_p7 = scmp.lt.u32.totalorder %s3222_s11, %s4349_s10 }
  0xbc   : > { %p3225_p4 = pnand %p3223_p12, %p4350_p0 }
  0xbe   : > { %p3226_p1 = pneg %p3225_p4 }
  0xc0   : > { %p3231_p8 = pnand %p3229_p7, %p3226_p1 }
  0xc2   : > { %3234 = shalt.err (!%p3231_p8)
}
  0xc3   : > { %s3235_s26 = scalar_lea.vmem %s611_s30, 32  ;;  %p3243_p11 = scmp.lt.s32.totalorder %s611_s30, %s611_s30 }
  0xc4   : > { %p3236_p13 = scmp.ne.s32.totalorder %s611_s30, %s3235_s26  ;;  %p3244_p9 = scmp.lt.s32.totalorder %s3235_s26, %s3235_s26 }
  0xc6   : > { %p3238_p6 = pnand %p3236_p13, %p4350_p0  ;;  %p3245_p3 = por %p3244_p9, %p3243_p11 }
  0xc8   : > { %p3239_p10 = pneg %p3238_p6 }
  0xca   : > { %p3246_p5 = pnand %p3245_p3, %p3239_p10 }
  0xcc   : > { %3249 = shalt.err (!%p3246_p5)
}
  0xcd   : > { %p4351_p12 = scmp.ne.s32.totalorder %s4333_s5, 0  ;;  %s4352_s18 = sld [smem:[#allocation35_spill]] }
  0xcf   : > { %2937 = dma.hbm_to_vmem [thread:$0]  (!%p4351_p12), %s4349_s10, 32, %s611_s30, [#allocation7]  }
  0xd3   : > { %s3250_s2 = scalar_lea.hbm %s4352_s18, 128 }
  0xd4   : > { %p3251_p4 = scmp.ne.s32.totalorder %s4352_s18, %s3250_s2  ;;  %p3257_p5 = scmp.lt.u32.totalorder %s3250_s2, %s4352_s18 }
  0xd6   : > { %p3253_p1 = pnand %p3251_p4, %p4350_p0 }
  0xd8   : > { %p3254_p7 = pneg %p3253_p1 }
  0xda   : > { %p3259_p8 = pnand %p3257_p5, %p3254_p7 }
  0xdc   : > { %3262 = shalt.err (!%p3259_p8)
}
  0xdd   : > { %s3263_s26 = scalar_lea.vmem %s636_s4, 128  ;;  %p3271_p11 = scmp.lt.s32.totalorder %s636_s4, %s636_s4 }
  0xde   : > { %p3264_p13 = scmp.ne.s32.totalorder %s636_s4, %s3263_s26  ;;  %p3272_p9 = scmp.lt.s32.totalorder %s3263_s26, %s3263_s26 }
  0xe0   : > { %p3266_p6 = pnand %p3264_p13, %p4350_p0  ;;  %p3273_p3 = por %p3272_p9, %p3271_p11 }
  0xe2   : > { %p3267_p10 = pneg %p3266_p6 }
  0xe4   : > { %p3274_p2 = pnand %p3273_p3, %p3267_p10 }
  0xe6   : > { %3277 = shalt.err (!%p3274_p2)
}
  0xe7   : > { %2943 = dma.hbm_to_vmem [thread:$0]  (!%p4351_p12), %s4352_s18, 128, %s636_s4, [#allocation10]  }
  0xe8   : > { %s4353_s16 = sld [smem:[#allocation44_spill]]  ;;  %s779_s2 = scalar_lea.vmem [#allocation18], %s3730_s15 }
  0xe9   : > { %s786_s13 = sshll.u32 %s779_s2, 4  ;;  %p4354_p4 = scmp.ne.s32.totalorder %s4343_s21, 0  ;;  %s787_s13 = int_to_ptr.vmem [resolvable:$true] %s786_s13 }
  0xee   : > { %s3896_s12 = scalar_lea.hbm %s4353_s16, %s3733_s0  ;;  %s3283_s4 = scalar_lea.hbm %s4353_s16, 32 }
  0xef   : > { %s3278_s25 = scalar_lea.hbm %s3896_s12, 16  ;;  %p3284_p5 = scmp.lt.u32.totalorder %s3896_s12, %s4353_s16 }
  0xf0   : > { %p3279_p2 = scmp.ne.s32.totalorder %s3896_s12, %s3278_s25  ;;  %p3285_p8 = scmp.lt.u32.totalorder %s3283_s4, %s3278_s25 }
  0xf1   : > { %p3287_p6 = scmp.lt.u32.totalorder %s3278_s25, %s3896_s12 }
  0xf2   : > { %p3281_p1 = pnand %p3279_p2, %p4354_p4  ;;  %p3286_p13 = por %p3285_p8, %p3284_p5 }
  0xf4   : > { %p3282_p7 = pneg %p3281_p1  ;;  %p3288_p10 = por %p3287_p6, %p3286_p13 }
  0xf6   : > { %p3289_p11 = pnand %p3288_p10, %p3282_p7 }
  0xf8   : > { %3292 = shalt.err (!%p3289_p11)
}
  0xf9   : > { %s3293_s24 = scalar_lea.vmem %s787_s13, 16  ;;  %s3513_s29 = smov [#allocation18]  }
  0xfa   : > { %p3294_p9 = scmp.ne.s32.totalorder %s787_s13, %s3293_s24  ;;  %s3298_s11 = sshll.u32 %s3513_s29, 4  ;;  %s3299_s11 = int_to_ptr.vmem [resolvable:$false] %s3298_s11 }
  0xfb   : > { %s3300_s2 = scalar_lea.vmem %s3299_s11, 32  ;;  %p3301_p1 = scmp.lt.s32.totalorder %s787_s13, %s3299_s11 }
  0xfc   : > { %p3296_p3 = pnand %p3294_p9, %p4354_p4  ;;  %p3302_p12 = scmp.lt.s32.totalorder %s3300_s2, %s3293_s24 }
  0xfe   : > { %p3297_p2 = pneg %p3296_p3  ;;  %p3303_p0 = por %p3302_p12, %p3301_p1 }
 0x100   : > { %p3304_p5 = pnand %p3303_p0, %p3297_p2 }
 0x102   : > { %3307 = shalt.err (!%p3304_p5)
}
 0x103   : > { %p4355_p8 = scmp.ne.s32.totalorder %s4341_s27, 0  ;;  %s3514_s25 = smov [#allocation8]  }
 0x104   : > { %s624_s3 = sshll.u32 %s3514_s25, 4  ;;  %s3515_s20 = smov [#allocation11]   ;;  %s625_s3 = int_to_ptr.vmem [resolvable:$true] %s624_s3 }
 0x105   : > { %2965 = dma.hbm_to_vmem [thread:$0]  (!%p4355_p8), %s3896_s12, 16, %s787_s13, %s3757_s6  }
 0x106   : > { %s646_s4 = sshll.u32 %s3515_s20, 4  ;;  %s4356_s29 = sld [smem:[#allocation34_spill]]  ;;  %s647_s4 = int_to_ptr.vmem [resolvable:$true] %s646_s4 }
 0x107   : > { %p4358_p12 = scmp.ne.s32.totalorder %s4336_s22, 0 }
 0x10c   : > { %s4357_s10 = smov %s4356_s29  ;;  %s3308_s14 = scalar_lea.hbm %s4356_s29, 16 }
 0x10d   : > { %p3309_p0 = scmp.ne.s32.totalorder %s4357_s10, %s3308_s14  ;;  %p3315_p6 = scmp.lt.u32.totalorder %s3308_s14, %s4357_s10 }
 0x10f   : > { %p3311_p7 = pnand %p3309_p0, %p4358_p12 }
 0x111   : > { %p3312_p13 = pneg %p3311_p7 }
 0x113   : > { %p3317_p10 = pnand %p3315_p6, %p3312_p13 }
 0x115   : > { %3320 = shalt.err (!%p3317_p10)
}
 0x116   : > { %s3321_s12 = scalar_lea.vmem %s625_s3, 16  ;;  %s3328_s13 = scalar_lea.vmem %s625_s3, 32 }
 0x117   : > { %p3322_p11 = scmp.ne.s32.totalorder %s625_s3, %s3321_s12  ;;  %p3329_p2 = scmp.lt.s32.totalorder %s625_s3, %s625_s3 }
 0x118   : > { %p3330_p1 = scmp.lt.s32.totalorder %s3328_s13, %s3321_s12 }
 0x119   : > { %p3324_p9 = pnand %p3322_p11, %p4358_p12 }
 0x11a   : > { %p3331_p5 = por %p3330_p1, %p3329_p2 }
 0x11b   : > { %p3325_p3 = pneg %p3324_p9 }
 0x11d   : > { %p3332_p8 = pnand %p3331_p5, %p3325_p3 }
 0x11f   : > { %3335 = shalt.err (!%p3332_p8)
}
 0x120   : > { %p4359_p0 = scmp.ne.s32.totalorder %s4333_s5, 0  ;;  %s4360_s26 = sld [smem:[#allocation36_spill]] }
 0x122   : > { %2940 = dma.hbm_to_vmem [thread:$0]  (!%p4359_p0), %s4357_s10, 16, %s625_s3, [#allocation7]  }
 0x126   : > { %s3336_s30 = scalar_lea.hbm %s4360_s26, 16 }
 0x127   : > { %p3337_p7 = scmp.ne.s32.totalorder %s4360_s26, %s3336_s30  ;;  %p3343_p8 = scmp.lt.u32.totalorder %s3336_s30, %s4360_s26 }
 0x129   : > { %p3339_p13 = pnand %p3337_p7, %p4358_p12 }
 0x12b   : > { %p3340_p6 = pneg %p3339_p13 }
 0x12d   : > { %p3345_p10 = pnand %p3343_p8, %p3340_p6 }
 0x12f   : > { %3348 = shalt.err (!%p3345_p10)
}
 0x130   : > { %s3349_s12 = scalar_lea.vmem %s647_s4, 16  ;;  %s3356_s3 = scalar_lea.vmem %s647_s4, 32 }
 0x131   : > { %p3350_p11 = scmp.ne.s32.totalorder %s647_s4, %s3349_s12  ;;  %p3357_p2 = scmp.lt.s32.totalorder %s647_s4, %s647_s4 }
 0x132   : > { %p3358_p1 = scmp.lt.s32.totalorder %s3356_s3, %s3349_s12 }
 0x133   : > { %p3352_p9 = pnand %p3350_p11, %p4358_p12 }
 0x134   : > { %p3359_p5 = por %p3358_p1, %p3357_p2 }
 0x135   : > { %p3353_p3 = pneg %p3352_p9 }
 0x137   : > { %p3360_p4 = pnand %p3359_p5, %p3353_p3 }
 0x139   : > { %3363 = shalt.err (!%p3360_p4)
}
 0x13a   : > { %2946 = dma.hbm_to_vmem [thread:$0]  (!%p4359_p0), %s4360_s26, 16, %s647_s4, [#allocation10]  }
 0x13b   : > { %s3516_s20 = smov [#allocation12]   ;;  %s4361_s7 = sld [smem:[#allocation37_spill]] }
 0x13c   : > { %s656_s14 = sshll.u32 %s3516_s20, 4  ;;  %s657_s14 = int_to_ptr.vmem [resolvable:$true] %s656_s14 }
 0x141   : > { %s3364_s29 = scalar_lea.hbm %s4361_s7, 256 }
 0x142   : > { %p3365_p7 = scmp.ne.s32.totalorder %s4361_s7, %s3364_s29  ;;  %p3371_p6 = scmp.lt.u32.totalorder %s3364_s29, %s4361_s7 }
 0x144   : > { %p3367_p4 = pnand %p3365_p7, %p4358_p12 }
 0x146   : > { %p3368_p13 = pneg %p3367_p4 }
 0x148   : > { %p3373_p8 = pnand %p3371_p6, %p3368_p13 }
 0x14a   : > { %3376 = shalt.err (!%p3373_p8)
}
 0x14b   : > { %s3377_s4 = scalar_lea.vmem %s657_s14, 256  ;;  %p3385_p3 = scmp.lt.s32.totalorder %s657_s14, %s657_s14 }
 0x14c   : > { %p3378_p10 = scmp.ne.s32.totalorder %s657_s14, %s3377_s4  ;;  %p3386_p2 = scmp.lt.s32.totalorder %s3377_s4, %s3377_s4 }
 0x14e   : > { %p3380_p11 = pnand %p3378_p10, %p4358_p12  ;;  %p3387_p1 = por %p3386_p2, %p3385_p3 }
 0x150   : > { %p3381_p9 = pneg %p3380_p11 }
 0x152   : > { %p3388_p5 = pnand %p3387_p1, %p3381_p9 }
 0x154   : > { %3391 = shalt.err (!%p3388_p5)
}
 0x155   : > { %s3517_s3 = smov 128   ;;  %s3518_s13 = smov 8  }
 0x156   : > { %2949 = dma.hbm_to_vmem [thread:$0]  (!%p4359_p0), %s4361_s7, 256, %s657_s14, [#allocation13], %s3517_s3, %s3517_s3, %s3518_s13  }
 0x157   : > { %s3975_s30 = scalar_lea.hbm %s4276_s17, %s3733_s0  ;;  %s796_s29 = scalar_lea.vmem [#allocation19], %s3730_s15 }
 0x158   : > { %s803_s11 = sshll.u32 %s796_s29, 4  ;;  %s3392_s24 = scalar_lea.hbm %s3975_s30, 16  ;;  %s804_s11 = int_to_ptr.vmem [resolvable:$true] %s803_s11 }
 0x159   : > { %p3393_p12 = scmp.ne.s32.totalorder %s3975_s30, %s3392_s24  ;;  %p4362_p7 = scmp.ne.s32.totalorder %s4343_s21, 0 }
 0x15a   : > { %s3397_s14 = scalar_lea.hbm %s4276_s17, 32  ;;  %p3398_p0 = scmp.lt.u32.totalorder %s3975_s30, %s4276_s17 }
 0x15b   : > { %p3395_p4 = pnand %p3393_p12, %p4362_p7  ;;  %p3399_p6 = scmp.lt.u32.totalorder %s3397_s14, %s3392_s24 }
 0x15c   : > { %p3401_p10 = scmp.lt.u32.totalorder %s3392_s24, %s3975_s30 }
 0x15d   : > { %p3396_p13 = pneg %p3395_p4  ;;  %p3400_p8 = por %p3399_p6, %p3398_p0 }
 0x15f   : > { %p3402_p11 = por %p3401_p10, %p3400_p8 }
 0x161   : > { %p3403_p9 = pnand %p3402_p11, %p3396_p13 }
 0x163   : > { %3406 = shalt.err (!%p3403_p9)
}
 0x164   : > { %s3407_s15 = scalar_lea.vmem %s804_s11, 16  ;;  %s3519_s0 = smov [#allocation19]  }
 0x165   : > { %p3408_p3 = scmp.ne.s32.totalorder %s804_s11, %s3407_s15  ;;  %s3412_s3 = sshll.u32 %s3519_s0, 4  ;;  %s3413_s3 = int_to_ptr.vmem [resolvable:$false] %s3412_s3 }
 0x166   : > { %s3414_s13 = scalar_lea.vmem %s3413_s3, 32  ;;  %p3415_p5 = scmp.lt.s32.totalorder %s804_s11, %s3413_s3 }
 0x167   : > { %p3410_p2 = pnand %p3408_p3, %p4362_p7  ;;  %p3416_p12 = scmp.lt.s32.totalorder %s3414_s13, %s3407_s15 }
 0x169   : > { %p3411_p1 = pneg %p3410_p2  ;;  %p3417_p4 = por %p3416_p12, %p3415_p5 }
 0x16b   : > { %p3418_p0 = pnand %p3417_p4, %p3411_p1 }
 0x16d   : > { %3421 = shalt.err (!%p3418_p0)
}
 0x16e   : > { %p4363_p6 = scmp.ne.s32.totalorder %s4341_s27, 0  ;;  %p4364_p13 = scmp.ne.s32.totalorder %s4332_s1, 0 }
 0x16f   : > { %p4365_p7 = scmp.eq.s32.totalorder (!%p4364_p13), %s3665_s23, 0 }
 0x170   : > { %2968 = dma.hbm_to_vmem [thread:$0]  (!%p4363_p6), %s3975_s30, 16, %s804_s11, %s3757_s6  }
 0x171   : > { %818 = sbr.rel (%p4364_p13) target bundleno = 3825 (0xef1), region = 104 }
 0x178   : > { %3465 = dma.done.wait (%p4365_p7), [#allocation4], 32   ;;  %p4366_p8 = pmov %p4365_p7 }
 0x179   : > { %p4367_p10 = pmov %p4365_p7 }
 0x17a   : > { %3467 = vsyncadd (%p4366_p8), [#allocation4], 4294967264 }
 0x17b   : > { %3469 = dma.done.wait (%p4367_p10), [#allocation7], 48   ;;  %p4368_p11 = pmov %p4365_p7 }
 0x17c   : > { %p4369_p9 = pmov %p4365_p7 }
 0x17d   : > { %3471 = vsyncadd (%p4368_p11), [#allocation7], 4294967248 }
 0x17e   : > { %3473 = dma.done.wait (%p4369_p9), [#allocation10], 144   ;;  %p4370_p3 = pmov %p4365_p7 }
 0x180   : > { %3475 = vsyncadd (%p4370_p3), [#allocation10], 4294967152  ;;  %p4371_p2 = pmov %p4370_p3 }
 0x182   : > { %3477 = dma.done.wait (%p4371_p2), [#allocation13], 256   ;;  %p4372_p1 = pmov %p4371_p2 }
 0x183   : > { %s844_s1 = sand.u32 1, %s3665_s23   ;;  %s4016_s6 = sand.u32 1, %s3494_s28  }
 0x184   : > { %3479 = vsyncadd (%p4372_p1), [#allocation13], 4294967040  ;;  %s845_s27 = scalar_lea.sflag [#allocation4], %s844_s1  ;;  %p4373_p5 = scmp.ne.s32.totalorder %s4339_s19, 0 }
 0x186   : > { %3481 = dma.done.wait (%p4373_p5), %s845_s27, 96  }
 0x187   : > { %3483 = vsyncadd (%p4373_p5), %s845_s27, 4294967200  ;;  %p985_p12 = scmp.lt.s32.totalorder %s3665_s23, 1  ;;  %s4374_s14 = sld [smem:[#allocation41_spill]] }
 0x188   : > { %s4375_s3 = sld [smem:[#allocation43_spill]]  ;;  %s4376_s22 = sld [smem:[#allocation45_spill]] }
 0x189   : > { %s4025_s25 = scalar_select %p985_p12, %s3665_s23, 1 }
 0x18a   : > { %s855_s21 = scalar_lea.vmem [#allocation15], %s4016_s6  ;;  %s863_s7 = scalar_lea.vmem [#allocation16], %s4016_s6 }
 0x18b   : > { %s2606_s20 = sshll.u32 %s4025_s25, 6  ;;  %s2608_s16 = sshll.u32 %s4025_s25, 5 }
 0x18c   : > { %s4032_s19 = scalar_lea.vmem %s4267_s8, %s2606_s20  ;;  %s4037_s24 = scalar_lea.vmem %s4268_s9, %s2606_s20 }
 0x18d   : > { %s4042_s12 = scalar_lea.vmem %s4374_s14, %s2608_s16  ;;  %s2609_s4 = sshll.u32 %s4025_s25, 7 }
 0x18e   : > { %s4048_s13 = scalar_lea.vmem %s4375_s3, %s2609_s4  ;;  %s1007_s30 = scalar_lea.vmem %s4376_s22, %s4025_s25 }
 0x18f   : > { %s871_s29 = scalar_lea.vmem [#allocation17], %s4016_s6  ;;  %s879_s20 = scalar_lea.vmem [#allocation18], %s4016_s6 }
 0x190   : > { %s887_s11 = scalar_lea.vmem [#allocation19], %s4016_s6  ;;  %p4377_p4 = scmp.ne.s32.totalorder %s3665_s23, 0 }
 0x191   : > { %s4378_s2 = sld [smem:[#allocation33_spill]] (!%p4377_p4)  ;;  %s4379_s3 = sld [smem:[#allocation30_spill]] (!%p4377_p4)  ;;  %vm1023_vm0 = vcmask (!%p4377_p4), 130048   ;;  %v3520_v4 = vmov (!%p4377_p4), 0.0   ;;  %v1106_v5 = vld [vmem:[#allocation9] sm:$0xff] (!%p4377_p4)  ;;  %vm1114_vm1 = vcmask (!%p4377_p4), 64512  }
 0x192   : > { %1011 = sbr.rel (%p4377_p4) target bundleno = 639 (0x27f), region = 156  ;;  %2681 = vmatprep.subr.mxu1 (!%p4377_p4), %v3520_v4  ;;  %v1105_v6 = vld [vmem:[#allocation6] sm:$0x3] (!%p4377_p4)  ;;  %vm3521_vm2 = vmmov (!%p4377_p4), 0   ;;  %v1190_v8 = vld [vmem:[#allocation3] sm:$0x1] (!%p4377_p4) }
 0x193   : > { %2682 = vmatpush3.msra.mxu1 (!%p4377_p4), %v1106_v5  ;;  %2683 = vmatprep.mubr.msk.f32.mxu1 (!%p4377_p4), %vm3521_vm2, %v3520_v4  ;;  %vm1191_vm3 = vcmask (!%p4377_p4), 253952   ;;  %v1199_v9 = vld [vmem:[#allocation3 + $0x1] sm:$0x1] (!%p4377_p4)  ;;  %v2565_v10 = vld [vmem:[#allocation11] ss:$0 sm:$0xff] (!%p4377_p4)  ;;  %vm1201_vm4 = vcmask (!%p4377_p4), 254977  }
 0x194   : > { %2684 = vmatmul.mubr.msk.f32.vlgmr.msra.gmra.mrb[0].mxu1 (!%p4377_p4), %vm1114_vm1, %v1105_v6  ;;  %1192 = vst.msk [vmem:[#allocation2 + $0x6] sm:$0x1] (!%p4377_p4), %vm1191_vm3, %v1190_v8  ;;  %1200 = vst.msk [vmem:[#allocation2 + $0xe] sm:$0x1] (!%p4377_p4), %vm1191_vm3, %v1199_v9  ;;  %v2562_v14 = vld [vmem:[#allocation8] ss:$0 sm:$0xff] (!%p4377_p4) }
 0x195   : > { %vm1196_vm5 = vcmask (!%p4377_p4), 257024   ;;  %vm1188_vm6 = vcmask (!%p4377_p4), 259072   ;;  %vm1194_vm7 = vcmask (!%p4377_p4), 261126   ;;  %vm1204_vm8 = vcmask (!%p4377_p4), 261120  }
 0x197   : > { %v1014_v0 = vld [vmem:[%s4378_s2] sm:$0xff] (!%p4377_p4)  ;;  %v1015_v1 = vld [vmem:[%s4378_s2 + $0x8] sm:$0xff] (!%p4377_p4)  ;;  %s4380_s1 = smov (!%p4377_p4), %s4379_s3 }
 0x198   : > { %v1012_v2 = vld [vmem:[%s4379_s3] sm:$0xff] (!%p4377_p4)  ;;  %v2793_v3 = vpack.c.bf16 (!%p4377_p4), %v1015_v1, %v1014_v0  ;;  %v1013_v7 = vld [vmem:[%s4380_s1 + $0x8] sm:$0xf] (!%p4377_p4) }
 0x199   : > { %2678 = vmatprep.mubr.msk.f32.mxu0 %vm1023_vm0, %v1012_v2 }
 0x19a   : > { %2794 = vmatprep.subr.bf16.mxu0 %v2793_v3 }
 0x19b   : > { %2796 = vmatpush3.bf16.msra.mxu0 %v2793_v3 }
 0x19e   : > { %2679 = vmatmul.mubr.msk.f32.vlgmr.msra.gmra.mrb[0].mxu0 %vm1023_vm0, %v1013_v7 }
 0x267   : > { %v1184_v11 = vpop.f32.mrb[0].mxu1 }
 0x268   : > { %v1185_v12 = vadd.f32 %v2565_v10, %v1184_v11  ;;  %v2685_v13 = vpop.f32.mrb[1].mxu1 }
 0x26a   : > { %1193 = vst.msk [vmem:[#allocation2 + $0x7] sm:$0x1] %vm1191_vm3, %v1185_v12 }
 0x26b   : > { %1202 = vst.msk [vmem:[#allocation2 + $0xe] sm:$0x2] %vm1201_vm4, %v1185_v12 }
 0x271   : > { %v2680_v15 = vpop.f32.mrb[0].mxu0 }
 0x272   : > { %v1102_v16 = vadd.f32 %v2680_v15, %v2562_v14  ;;  %v1096_v17 = vpop.f32.mrb[1].mxu0 }
 0x273   : > { %v1097_v18 = vadd.f32 %v2562_v14, %v1096_v17 }
 0x274   : > { %1197 = vst.msk [vmem:[#allocation2 + $0xa] sm:$0xf] %vm1196_vm5, %v1102_v16 }
 0x275   : > { %1189 = vst.msk [vmem:[#allocation2] sm:$0x3f] %vm1188_vm6, %v1097_v18 }
 0x276   : > { %1195 = vst.msk [vmem:[#allocation2 + $0x2] sm:$0xc0] %vm1194_vm7, %v1097_v18 }
 0x27c   : > { %v1203_v19 = vld [vmem:[#allocation2] sm:$0xff] }
 0x27d   : > { %v1206_v20 = vld [vmem:[#allocation2 + $0x8] sm:$0xff]  ;;  %1205 = vst.msk [vmem:[#allocation20] sm:$0xff] %vm1204_vm8, %v1203_v19 }
 0x27e   : > { %1208 = vst.msk [vmem:[#allocation20 + $0x8] sm:$0xff] %vm1204_vm8, %v1206_v20 }
 0x27f PF: > { %v1212_v21 = vld [vmem:[%s4032_s19 + $0x8] sm:$0xff]  ;;  %v1214_v22 = vld [vmem:[%s4032_s19 + $0x18] sm:$0xff]  ;;  %v1211_v23 = vld [vmem:[%s4032_s19] sm:$0xff]  ;;  %v3522_v28 = vmov 0.0   ;;  %vm1219_vm9 = vcmask 261120   ;;  %vm1398_vm11 = vcmask 130048  }
 0x280   : > { %v2797_v24 = vpack.c.bf16 %v1214_v22, %v1212_v21  ;;  %v1213_v25 = vld [vmem:[%s4032_s19 + $0x10] sm:$0xff]  ;;  %v1216_v26 = vld [vmem:[%s4032_s19 + $0x28] sm:$0xff]  ;;  %v1218_v27 = vld [vmem:[%s4032_s19 + $0x38] sm:$0xff]  ;;  %1290 = vmatprep.mubr.f32.mxu0 %v3522_v28  ;;  %s3524_s16 = smov 32   ;;  %s3525_s5 = smov 96  }
 0x281   : > { %v2799_v29 = vpack.c.bf16 %v1213_v25, %v1211_v23  ;;  %v2801_v30 = vpack.c.bf16 %v1218_v27, %v1216_v26  ;;  %v1215_v31 = vld [vmem:[%s4032_s19 + $0x20] sm:$0xff]  ;;  %v1217_v32 = vld [vmem:[%s4032_s19 + $0x30] sm:$0xff]  ;;  %v4085_v35 = vld [vmem:[#allocation2 + $0x8] sm:$0xff]  ;;  %s3523_s19 = smov 64   ;;  %s4383_s14 = scalar_lea.vmem [#allocation14], %s4016_s6 }
 0x282   : > { %2798 = vmatprep.subr.bf16.mxu0 %v2797_v24  ;;  %v2803_v33 = vpack.c.bf16 %v1217_v32, %v1215_v31  ;;  %v4081_v34 = vld [vmem:[#allocation2] sm:$0xff]  ;;  %vm4100_vm10 = vmpackc.low %vm1219_vm9, %vm1219_vm9  ;;  %v1304_v50 = vld [vmem:[#allocation12 + $0x8] sm:$0xff]  ;;  %p2598_p0 = scmp.ne.s32.totalorder %s3665_s23, 1 }
 0x283   : > { %2800 = vmatpush1.bf16.msra.mxu0 %v2799_v29  ;;  %v1303_v51 = vld [vmem:[#allocation12] sm:$0xff]  ;;  %s4386_s3 = sld [smem:[#allocation47_spill]] (!%p2598_p0)  ;;  %vm2267_vm12 = vcmask (!%p2598_p0), 64512  }
 0x284   : > { %2802 = vmatprep.subr.bf16.mxu0 %v2801_v30 }
 0x287   : > { %2804 = vmatpush1.bf16.msra.mxu0 %v2803_v33 }
 0x28a   : > { %2567 = vmatmul.mubr.msk.f32.vlgmr.msra.gmra.mrb[0].mxu0 %vm1219_vm9, %v4081_v34 }
 0x28b   : > { %1296 = vmatprep.mubr.f32.mxu0 %v3522_v28 }
 0x28e   : > { %2568 = vmatmul.mubr.msk.f32.gmra.mrb[2].mxu0 %vm1219_vm9, %v4085_v35 }
 0x35d   : > { %v1292_v36 = vpop.f32.mrb[0].mxu0 }
 0x35e   : > { %v1305_v37 = vmul.f32 0.17677669, %v1292_v36  ;;  %v4089_v38 = vpop.f32.mrb[1].mxu0 }
 0x360   : > { %2690 = vmatprep.mubr.msk.f32.mxu0 %vm1219_vm9, %v1305_v37 }
 0x361   : > { %v1298_v39 = vpop.f32.mrb[2].mxu0 }
 0x362   : > { %v3040_v40 = vpack.i.bf16 %v1298_v39, %v1292_v36  ;;  %v4092_v41 = vpop.f32.mrb[3].mxu0  ;;  %v1306_v49 = vmul.f32 0.17677669, %v1298_v39  ;;  %v2581_v36 = vld [vmem:[%s4037_s24 + $0x20] sm:$0xff]  ;;  %v2583_v39 = vld [vmem:[%s4037_s24 + $0x30] sm:$0xff] }
 0x363   : > { %v3045_v42 = vpack.i.bf16 %v4092_v41, %v4089_v38  ;;  %v2811_v43 = vpack.c.bf16 %v4092_v41, %v4089_v38 }
 0x364   : > { %3036 = vrot.lane.b32.xlu0 %v3040_v40, %s3523_s19  ;;  %s4387_s19 = sld [smem:[#allocation48_spill]] (!%p2598_p0) }
 0x3d6   : > { %v3037_v44 = vpop.permute.xlu0 %3036 }
 0x3d7   : > { %v3039_v45 = vunpack.i.h.bf16 %v3037_v44  ;;  %v3038_v46 = vunpack.i.l.bf16 %v3037_v44 }
 0x3d9   : > { %v2805_v48 = vpack.c.bf16 %v3039_v45, %v3038_v46 }
 0x3db   : > { %2807 = vmatprep.subr.msk.bf16.mxu0 %vm4100_vm10, %v2805_v48 }
 0x3dc   : > { %2810 = vmatpush3.bf16.xpose.msk.msra.mxu0 %vm4100_vm10, %v2805_v48 }
 0x3dd   : > { %2812 = vmatprep.subr.bf16.mxu0 %v2811_v43 }
 0x3e3   : > { %2691 = vmatmul.mubr.msk.f32.vlgmr.msra.gmra.mrb[4].mxu0 %vm1219_vm9, %v1306_v49 }
 0x3e4   : > { %2814 = vmatpush3.bf16.msra.mxu0 %v2811_v43  ;;  %v2584_v43 = vld [vmem:[%s4037_s24 + $0x38] sm:$0xff] }
 0x3e5   : > { %v2829_v44 = vpack.c.bf16 %v2584_v43, %v2583_v39  ;;  %v2027_v39 = vld [vmem:[%s4048_s13 + $0x10] sm:$0xff] }
 0x4b6   : > { %v2692_v52 = vpop.f32.mrb[4].mxu0 }
 0x4b7   : > { %v1395_v53 = vadd.f32 %v2692_v52, %v1304_v50  ;;  %v1389_v54 = vpop.f32.mrb[5].mxu0  ;;  %v1502_v52 = vld [vmem:[%s4037_s24] sm:$0xff] }
 0x4b8   : > { %v1390_v55 = vadd.f32 %v1389_v54, %v1303_v51 }
 0x4b9   : > { %v1402_v56 = vsel %vm1398_vm11, %v1395_v53, -inf }
 0x4ba   : > { %1403 = vmax.xlane.f32.xlu1 %v1402_v56  ;;  %v1399_v57 = vsel %vm1398_vm11, %v1390_v55, -inf  ;;  %v1505_v56 = vld [vmem:[%s4037_s24 + $0x18] sm:$0xff] }
 0x4bb   : > { %1400 = vmax.xlane.f32.xlu0 %v1399_v57 }
 0x4cb   : > { %3041 = vrot.lane.b32.xlu1 %v3040_v40, %s3524_s16 }
 0x4cf   : > { %1506 = vrot.lane.b32.xlu1 %v1305_v37, %s3525_s5  ;;  %v2582_v37 = vld [vmem:[%s4037_s24 + $0x28] sm:$0xff] }
 0x4d0   : > { %v2825_v40 = vpack.c.bf16 %v2582_v37, %v2581_v36 }
 0x547   : > { %v1404_v58 = vpop.xlane.xlu1 %1403 }
 0x548   : > { %v1406_v59 = vsub.f32 %v1395_v53, %v1404_v58  ;;  %v1401_v60 = vpop.xlane.xlu0 %1400  ;;  %v1503_v53 = vld [vmem:[%s4037_s24 + $0x8] sm:$0xff] }
 0x549   : > { %v1405_v61 = vsub.f32 %v1390_v55, %v1401_v60  ;;  %v2833_v54 = vpack.c.bf16 %v1503_v53, %v1502_v52  ;;  %v1504_v55 = vld [vmem:[%s4037_s24 + $0x10] sm:$0xff]  ;;  %v2589_v60 = vld [vmem:[%s4383_s14] ss:$0 sm:$0xff]  ;;  %v2036_v53 = vld [vmem:[%s4048_s13 + $0x58] sm:$0xff] }
 0x54a   : > { %v1409_v62 = vmul.f32 1.442695, %v1406_v59  ;;  %v2837_v59 = vpack.c.bf16 %v1505_v56, %v1504_v55  ;;  %v2035_v52 = vld [vmem:[%s4048_s13 + $0x50] sm:$0xff]  ;;  %v2037_v55 = vld [vmem:[%s4048_s13 + $0x60] sm:$0xff]  ;;  %v2038_v56 = vld [vmem:[%s4048_s13 + $0x68] sm:$0xff] }
 0x54b   : > { %v1407_v63 = vmul.f32 1.442695, %v1405_v61  ;;  %v3042_v0 = vpop.permute.xlu1 %3041 }
 0x54c   : > { %3050 = vpow2.f32 %v1409_v62  ;;  %v3044_v1 = vunpack.i.h.bf16 %v3042_v0  ;;  %v3043_v2 = vunpack.i.l.bf16 %v3042_v0 }
 0x54d   : > { %3052 = vpow2.f32 %v1407_v63 }
 0x54e   : > { %v2815_v3 = vpack.c.bf16 %v3044_v1, %v3043_v2 }
 0x54f   : > { %v1507_v8 = vpop.permute.xlu1 %1506 }
 0x550   : > { %2817 = vmatprep.subr.msk.bf16.mxu0 %vm4100_vm10, %v2815_v3 }
 0x556   : > { %v3051_v4 = vpop.eup %3050 }
 0x557   : > { %v1414_v5 = vsel %vm1398_vm11, %v3051_v4, 0.0  ;;  %v3053_v6 = vpop.eup %3052 }
 0x558   : > { %1415 = vadd.xlane.f32.xlu1 %v1414_v5  ;;  %v1411_v7 = vsel %vm1398_vm11, %v3053_v6, 0.0 }
 0x55c   : > { %1412 = vadd.xlane.f32.xlu1 %v1411_v7 }
 0x56d   : > { %1508 = vrot.lane.b32.xlu1 %v1306_v49, %s3525_s5 }
 0x5e5   : > { %v1416_v9 = vpop.xlane.xlu1 %1415 }
 0x5e6   : > { %3054 = vrcp.f32 %v1416_v9 }
 0x5e9   : > { %v1413_v10 = vpop.xlane.xlu1 %1412 }
 0x5ea   : > { %3056 = vrcp.f32 %v1413_v10 }
 0x5ed   : > { %v1509_v15 = vpop.permute.xlu1 %1508 }
 0x5f0   : > { %v3055_v11 = vpop.eup %3054 }
 0x5f1   : > { %v1420_v14 = vmul.f32 %v3055_v11, %v3051_v4 }
 0x5f4   : > { %v3057_v12 = vpop.eup %3056 }
 0x5f5   : > { %v1419_v13 = vmul.f32 %v3057_v12, %v3053_v6 }
 0x5f7   : > { %2697 = vmatprep.mubr.msk.f32.mxu0 %vm1398_vm11, %v1419_v13  ;;  %v1931_v13 = vld [vmem:[%s4042_s12] sm:$0xff] }
 0x5f8   : > { %2698 = vmatmul.mubr.msk.f32.vlgmr.msra.gmra.mrb[6].mxu0 %vm1398_vm11, %v1420_v14  ;;  %v1932_v14 = vld [vmem:[%s4042_s12 + $0x8] sm:$0xff] }
 0x5f9   : > { %2820 = vmatpush3.bf16.xpose.msk.msra.mxu0 %vm4100_vm10, %v2815_v3  ;;  %2704 = vmatprep.mubr.msk.f32.mxu0 %vm1219_vm9, %v1507_v8 }
 0x5fa   : > { %2826 = vmatprep.subr.bf16.mxu0 %v2825_v40 }
 0x600   : > { %2705 = vmatmul.mubr.msk.f32.vlgmr.msra.gmra.mrb[8].mxu0 %vm1219_vm9, %v1509_v15  ;;  %v2841_v15 = vpack.c.bf16 %v1932_v14, %v1931_v13 }
 0x601   : > { %2828 = vmatpush3.bf16.msra.mxu0 %v2825_v40  ;;  %v2028_v40 = vld [vmem:[%s4048_s13 + $0x18] sm:$0xff] }
 0x602   : > { %2830 = vmatprep.subr.bf16.mxu0 %v2829_v44 }
 0x605   : > { %2832 = vmatpush3.bf16.msra.mxu0 %v2829_v44 }
 0x606   : > { %2834 = vmatprep.subr.bf16.mxu0 %v2833_v54 }
 0x6cb   : > { %v4123_v16 = vpop.f32.mrb[6].mxu0 }
 0x6cc   : > { %v1493_v17 = vpop.f32.mrb[7].mxu0 }
 0x6d3   : > { %v2706_v18 = vpop.f32.mrb[8].mxu0 }
 0x6d4   : > { %v1594_v19 = vadd.f32 %v2706_v18, %v1304_v50  ;;  %v1588_v20 = vpop.f32.mrb[9].mxu0 }
 0x6d5   : > { %v1589_v21 = vadd.f32 %v1588_v20, %v1303_v51  ;;  %v2026_v20 = vld [vmem:[%s4048_s13 + $0x8] sm:$0xff] }
 0x6d6   : > { %v1600_v22 = vsel %vm1398_vm11, %v1594_v19, -inf }
 0x6d7   : > { %1601 = vmax.xlane.f32.xlu1 %v1600_v22  ;;  %v1597_v23 = vsel %vm1398_vm11, %v1589_v21, -inf }
 0x6d8   : > { %1598 = vmax.xlane.f32.xlu0 %v1597_v23 }
 0x764   : > { %v1602_v24 = vpop.xlane.xlu1 %1601 }
 0x765   : > { %v1604_v25 = vsub.f32 %v1594_v19, %v1602_v24  ;;  %v1599_v26 = vpop.xlane.xlu0 %1598  ;;  %v2025_v19 = vld [vmem:[%s4048_s13] sm:$0xff] }
 0x766   : > { %v1603_v27 = vsub.f32 %v1589_v21, %v1599_v26  ;;  %v2849_v21 = vpack.c.bf16 %v2026_v20, %v2025_v19 }
 0x767   : > { %v1607_v28 = vmul.f32 1.442695, %v1604_v25 }
 0x768   : > { %v1605_v29 = vmul.f32 1.442695, %v1603_v27 }
 0x769   : > { %3058 = vpow2.f32 %v1607_v28 }
 0x76a   : > { %3060 = vpow2.f32 %v1605_v29  ;;  %v2590_v29 = vld [vmem:[%s855_s21] ss:$0 sm:$0xff] }
 0x773   : > { %v3059_v30 = vpop.eup %3058 }
 0x774   : > { %v1612_v31 = vsel %vm1398_vm11, %v3059_v30, 0.0  ;;  %v3061_v32 = vpop.eup %3060 }
 0x775   : > { %1613 = vadd.xlane.f32.xlu0 %v1612_v31  ;;  %v1609_v33 = vsel %vm1398_vm11, %v3061_v32, 0.0  ;;  %v2591_v31 = vld [vmem:[%s863_s7] ss:$0 sm:$0xff] }
 0x779   : > { %1610 = vadd.xlane.f32.xlu0 %v1609_v33 }
 0x78f   : > { %3046 = vrot.lane.b32.xlu0 %v3045_v42, %s3525_s5 }
 0x802   : > { %v1614_v45 = vpop.xlane.xlu0 %1613 }
 0x803   : > { %3062 = vrcp.f32 %v1614_v45  ;;  %v2853_v45 = vpack.c.bf16 %v2028_v40, %v2027_v39 }
 0x806   : > { %v1611_v46 = vpop.xlane.xlu0 %1610 }
 0x807   : > { %3064 = vrcp.f32 %v1611_v46  ;;  %v2029_v46 = vld [vmem:[%s4048_s13 + $0x20] sm:$0xff] }
 0x80a   : > { %v3047_v47 = vpop.permute.xlu0 %3046 }
 0x80b   : > { %v3049_v38 = vunpack.i.h.bf16 %v3047_v47  ;;  %v3048_v41 = vunpack.i.l.bf16 %v3047_v47  ;;  %v2030_v47 = vld [vmem:[%s4048_s13 + $0x28] sm:$0xff] }
 0x80d   : > { %v2821_v42 = vpack.c.bf16 %v3049_v38, %v3048_v41  ;;  %v3063_v48 = vpop.eup %3062  ;;  %v2857_v38 = vpack.c.bf16 %v2030_v47, %v2029_v46  ;;  %v2031_v41 = vld [vmem:[%s4048_s13 + $0x30] sm:$0xff] }
 0x80e   : > { %v1618_v51 = vmul.f32 %v3063_v48, %v3059_v30 }
 0x80f   : > { %2822 = vmatprep.subr.bf16.mxu1 %v2821_v42 }
 0x810   : > { %2824 = vmatpush3.bf16.msra.mxu1 %v2821_v42  ;;  %v2032_v42 = vld [vmem:[%s4048_s13 + $0x38] sm:$0xff] }
 0x811   : > { %v3065_v49 = vpop.eup %3064  ;;  %2842 = vmatprep.subr.bf16.mxu1 %v2841_v15  ;;  %v2861_v48 = vpack.c.bf16 %v2032_v42, %v2031_v41 }
 0x812   : > { %v1617_v50 = vmul.f32 %v3065_v49, %v3061_v32  ;;  %v2033_v49 = vld [vmem:[%s4048_s13 + $0x40] sm:$0xff] }
 0x814   : > { %2711 = vmatprep.mubr.msk.f32.mxu1 %vm1398_vm11, %v1617_v50  ;;  %v2034_v50 = vld [vmem:[%s4048_s13 + $0x48] sm:$0xff] }
 0x815   : > { %2712 = vmatmul.mubr.msk.f32.vlgmr.msra.gmra.mrb[0].mxu1 %vm1398_vm11, %v1618_v51  ;;  %v2865_v51 = vpack.c.bf16 %v2034_v50, %v2033_v49 }
 0x816   : > { %2844 = vmatpush3.bf16.msra.mxu1 %v2841_v15 }
 0x8e8   : > { %v2713_v57 = vpop.f32.mrb[0].mxu1 }
 0x8e9   : > { %v1699_v58 = vpop.f32.mrb[1].mxu1 }
 0x8ea   : > { %2722 = vmatprep.mubr.msk.f32.mxu0 %vm1219_vm9, %v1699_v58  ;;  %v2039_v58 = vld [vmem:[%s4048_s13 + $0x70] sm:$0xff] }
 0x8eb   : > { %2723 = vmatmul.mubr.msk.f32.vlgmr.msra.gmra.mrb[10].mxu0 %vm1219_vm9, %v2713_v57  ;;  %v2873_v57 = vpack.c.bf16 %v2038_v56, %v2037_v55 }
 0x8ec   : > { %2836 = vmatpush3.bf16.msra.mxu0 %v2833_v54  ;;  %2733 = vmatprep.mubr.msk.f32.mxu0 %vm1219_vm9, %v1493_v17  ;;  %v1934_v17 = vld [vmem:[%s4042_s12 + $0x18] sm:$0xff]  ;;  %v2869_v54 = vpack.c.bf16 %v2036_v53, %v2035_v52 }
 0x8ed   : > { %2838 = vmatprep.subr.bf16.mxu0 %v2837_v59 }
 0x8f0   : > { %2840 = vmatpush3.bf16.msra.mxu0 %v2837_v59  ;;  %v2040_v59 = vld [vmem:[%s4048_s13 + $0x78] sm:$0xff]  ;;  %s4385_s13 = sld [smem:[#allocation46_spill]] (!%p2598_p0) }
 0x8f3   : > { %2734 = vmatmul.mubr.msk.f32.vlgmr.msra.gmra.mrb[10].mxu0 %vm1219_vm9, %v4123_v16  ;;  %v1933_v16 = vld [vmem:[%s4042_s12 + $0x10] sm:$0xff] }
 0x8f4   : > { %v2845_v18 = vpack.c.bf16 %v1934_v17, %v1933_v16 }
 0x8f6   : > { %2846 = vmatprep.subr.bf16.mxu1 %v2845_v18  ;;  %v2175_v40 = vld [vmem:[%s4385_s13] sm:$0xff] (!%p2598_p0)  ;;  %v2178_v46 = vld [vmem:[%s4385_s13 + $0x18] sm:$0xff] (!%p2598_p0) }
 0x8f7   : > { %2848 = vmatpush3.bf16.msra.mxu1 %v2845_v18 }
 0x8f8   : > { %2850 = vmatprep.subr.bf16.mxu1 %v2849_v21 }
 0x9c6   : > { %v2735_v61 = vpop.f32.mrb[10].mxu0 }
 0x9c7   : > { %v1883_v62 = vadd.f32 %v2735_v61, %v2589_v60  ;;  %v1866_v63 = vpop.f32.mrb[11].mxu0  ;;  %v2592_v61 = vld [vmem:[%s871_s29] ss:$0 sm:$0xff] }
 0x9c8   : > { %v1882_v0 = vadd.f32 %v2589_v60, %v1866_v63  ;;  %v2877_v60 = vpack.c.bf16 %v2040_v59, %v2039_v58 }
 0x9c9   : > { %v1885_v1 = vadd.f32 %v1883_v62, %v4085_v35 }
 0x9ca   : > { %v1884_v2 = vadd.f32 %v1882_v0, %v4081_v34 }
 0x9cb   : > { %v1891_v3 = vsel %vm1219_vm9, %v1885_v1, 0.0 }
 0x9cc   : > { %1892 = vadd.xlane.f32.xlu1 %v1891_v3  ;;  %v1888_v4 = vsel %vm1219_vm9, %v1884_v2, 0.0 }
 0x9cd   : > { %1889 = vadd.xlane.f32.xlu0 %v1888_v4  ;;  %v2595_v4 = vld [vmem:[%s879_s20] ss:$0 sm:$0xff] }
 0xa59   : > { %v1893_v5 = vpop.xlane.xlu1 %1892 }
 0xa5a   : > { %v1896_v6 = vmul.f32 0.03125, %v1893_v5  ;;  %v1890_v7 = vpop.xlane.xlu0 %1889 }
 0xa5b   : > { %v1895_v8 = vmul.f32 0.03125, %v1890_v7 }
 0xa5c   : > { %v1898_v9 = vsub.f32 %v1885_v1, %v1896_v6 }
 0xa5d   : > { %v1897_v10 = vsub.f32 %v1884_v2, %v1895_v8 }
 0xa5e   : > { %v1900_v35 = vmul.f32 %v1898_v9, %v1898_v9 }
 0xa5f   : > { %v1899_v11 = vmul.f32 %v1897_v10, %v1897_v10 }
 0xa60   : > { %v1904_v12 = vsel %vm1219_vm9, %v1900_v35, 0.0 }
 0xa61   : > { %v1901_v34 = vsel %vm1219_vm9, %v1899_v11, 0.0 }
 0xa62   : > { %1902 = vadd.xlane.f32.xlu1 %v1901_v34 }
 0xa66   : > { %1905 = vadd.xlane.f32.xlu1 %v1904_v12 }
 0xaef   : > { %v1903_v22 = vpop.xlane.xlu1 %1902 }
 0xaf0   : > { %v1907_v23 = vmul.f32 0.03125, %v1903_v22 }
 0xaf2   : > { %v1909_v24 = vadd.f32 1e-05, %v1907_v23 }
 0xaf3   : > { %v1906_v25 = vpop.xlane.xlu1 %1905 }
 0xaf4   : > { %3066 = vrsqrt.f32 %v1909_v24  ;;  %v1908_v26 = vmul.f32 0.03125, %v1906_v25 }
 0xaf6   : > { %v1910_v27 = vadd.f32 1e-05, %v1908_v26 }
 0xaf8   : > { %3068 = vrsqrt.f32 %v1910_v27 }
 0xafe   : > { %v3067_v28 = vpop.eup %3066 }
 0xaff   : > { %v1913_v30 = vmul.f32 %v3067_v28, %v1897_v10  ;;  %v2596_v28 = vld [vmem:[%s887_s11] ss:$0 sm:$0xff] }
 0xb01   : > { %v1921_v32 = vmul.f32 %v2590_v29, %v1913_v30  ;;  %v2597_v30 = vld [vmem:[%s1007_s30] ss:$0 sm:$0xff] }
 0xb02   : > { %v3069_v33 = vpop.eup %3068 }
 0xb03   : > { %v1914_v36 = vmul.f32 %v3069_v33, %v1898_v9  ;;  %v1929_v37 = vadd.f32 %v2591_v31, %v1921_v32 }
 0xb05   : > { %v1922_v43 = vmul.f32 %v2590_v29, %v1914_v36  ;;  %2744 = vmatprep.mubr.msk.f32.mxu1 %vm1219_vm9, %v1929_v37 }
 0xb07   : > { %v1930_v44 = vadd.f32 %v2591_v31, %v1922_v43  ;;  %v2176_v43 = vld [vmem:[%s4385_s13 + $0x8] sm:$0xff] (!%p2598_p0) }
 0xb09   : > { %2745 = vmatmul.mubr.msk.f32.vlgmr.msra.gmra.mrb[2].mxu1 %vm1219_vm9, %v1930_v44 }
 0xb0a   : > { %2852 = vmatpush3.bf16.msra.mxu1 %v2849_v21 }
 0xb0b   : > { %2854 = vmatprep.subr.bf16.mxu1 %v2853_v45 }
 0xb0e   : > { %2856 = vmatpush3.bf16.msra.mxu1 %v2853_v45  ;;  %v2881_v45 = vpack.c.bf16 (!%p2598_p0), %v2176_v43, %v2175_v40 }
 0xb0f   : > { %2858 = vmatprep.subr.bf16.mxu1 %v2857_v38 }
 0xb10   : > { %2882 = vmatprep.subr.bf16.mxu0 (!%p2598_p0), %v2881_v45 }
 0xb11   : > { %2884 = vmatpush3.bf16.msra.mxu0 (!%p2598_p0), %v2881_v45 }
 0xb12   : > { %2860 = vmatpush3.bf16.msra.mxu1 %v2857_v38  ;;  %v2599_v38 = vld [vmem:[%s4386_s3] ss:$0 sm:$0xff] (!%p2598_p0) }
 0xb13   : > { %2862 = vmatprep.subr.bf16.mxu1 %v2861_v48 }
 0xb16   : > { %2864 = vmatpush3.bf16.msra.mxu1 %v2861_v48 }
 0xb17   : > { %2866 = vmatprep.subr.bf16.mxu1 %v2865_v51 }
 0xb1a   : > { %2868 = vmatpush3.bf16.msra.mxu1 %v2865_v51 }
 0xb1b   : > { %2870 = vmatprep.subr.bf16.mxu1 %v2869_v54 }
 0xb1e   : > { %2872 = vmatpush3.bf16.msra.mxu1 %v2869_v54 }
 0xb1f   : > { %2874 = vmatprep.subr.bf16.mxu1 %v2873_v57 }
 0xb22   : > { %2876 = vmatpush3.bf16.msra.mxu1 %v2873_v57 }
 0xb23   : > { %2878 = vmatprep.subr.bf16.mxu1 %v2877_v60 }
 0xb26   : > { %2880 = vmatpush3.bf16.msra.mxu1 %v2877_v60 }
 0xbdc   : > { %v2746_v62 = vpop.f32.mrb[2].mxu1 }
 0xbdd   : > { %v2020_v63 = vadd.f32 %v2746_v62, %v2592_v61  ;;  %v2014_v0 = vpop.f32.mrb[3].mxu1 }
 0xbde   : > { %v2015_v1 = vadd.f32 %v2592_v61, %v2014_v0 }
 0xbdf   : > { %v2024_v3 = vmax.f32 %v2020_v63, 0.0 }
 0xbe0   : > { %v2023_v2 = vmax.f32 %v2015_v1, 0.0 }
 0xbe2   : > { %2779 = vmatprep.mubr.f32.mxu1 %v2023_v2 }
 0xbe3   : > { %2780 = vmatmul.mubr.f32.vlgmr.msra.gmra.mrb[4].mxu1 %v2024_v3 }
 0xcb6   : > { %v2781_v5 = vpop.f32.mrb[4].mxu1 }
 0xcb7   : > { %v2114_v6 = vpop.f32.mrb[5].mxu1  ;;  %v2120_v7 = vadd.f32 %v2781_v5, %v2595_v4 }
 0xcb8   : > { %v2115_v8 = vadd.f32 %v2595_v4, %v2114_v6 }
 0xcb9   : > { %v2124_v11 = vadd.f32 %v2120_v7, %v1930_v44  ;;  %v2177_v44 = vld [vmem:[%s4385_s13 + $0x10] sm:$0xff] (!%p2598_p0) }
 0xcba   : > { %v2123_v9 = vadd.f32 %v2115_v8, %v1929_v37  ;;  %v2885_v47 = vpack.c.bf16 (!%p2598_p0), %v2178_v46, %v2177_v44 }
 0xcbb   : > { %v2130_v34 = vsel %vm1219_vm9, %v2124_v11, 0.0 }
 0xcbc   : > { %v2127_v10 = vsel %vm1219_vm9, %v2123_v9, 0.0  ;;  %2886 = vmatprep.subr.bf16.mxu0 (!%p2598_p0), %v2885_v47 }
 0xcbd   : > { %2128 = vadd.xlane.f32.xlu1 %v2127_v10  ;;  %2888 = vmatpush3.bf16.msra.mxu0 (!%p2598_p0), %v2885_v47 }
 0xcc1   : > { %2131 = vadd.xlane.f32.xlu1 %v2130_v34 }
 0xd4a   : > { %v2129_v35 = vpop.xlane.xlu1 %2128 }
 0xd4b   : > { %v2133_v12 = vmul.f32 0.03125, %v2129_v35 }
 0xd4d   : > { %v2135_v13 = vsub.f32 %v2123_v9, %v2133_v12 }
 0xd4e   : > { %v2132_v14 = vpop.xlane.xlu1 %2131 }
 0xd4f   : > { %v2134_v15 = vmul.f32 0.03125, %v2132_v14  ;;  %v2137_v16 = vmul.f32 %v2135_v13, %v2135_v13 }
 0xd51   : > { %v2136_v17 = vsub.f32 %v2124_v11, %v2134_v15  ;;  %v2139_v18 = vsel %vm1219_vm9, %v2137_v16, 0.0 }
 0xd52   : > { %2140 = vadd.xlane.f32.xlu1 %v2139_v18 }
 0xd53   : > { %v2138_v19 = vmul.f32 %v2136_v17, %v2136_v17 }
 0xd55   : > { %v2142_v20 = vsel %vm1219_vm9, %v2138_v19, 0.0 }
 0xd56   : > { %2143 = vadd.xlane.f32.xlu1 %v2142_v20 }
 0xddf   : > { %v2141_v21 = vpop.xlane.xlu1 %2140 }
 0xde0   : > { %v2145_v22 = vmul.f32 0.03125, %v2141_v21 }
 0xde2   : > { %v2147_v23 = vadd.f32 1e-05, %v2145_v22 }
 0xde3   : > { %v2144_v24 = vpop.xlane.xlu1 %2143 }
 0xde4   : > { %3070 = vrsqrt.f32 %v2147_v23  ;;  %v2146_v25 = vmul.f32 0.03125, %v2144_v24 }
 0xde6   : > { %v2148_v26 = vadd.f32 1e-05, %v2146_v25 }
 0xde8   : > { %3072 = vrsqrt.f32 %v2148_v26 }
 0xdee   : > { %v3071_v27 = vpop.eup %3070 }
 0xdef   : > { %v2151_v29 = vmul.f32 %v3071_v27, %v2135_v13 }
 0xdf1   : > { %v2159_v31 = vmul.f32 %v2596_v28, %v2151_v29 }
 0xdf2   : > { %v3073_v32 = vpop.eup %3072 }
 0xdf3   : > { %v2167_v33 = vadd.f32 %v2597_v30, %v2159_v31  ;;  %v2152_v36 = vmul.f32 %v3073_v32, %v2136_v17  ;;  %2174 = sbr.rel (%p2598_p0) target bundleno = 3793 (0xed1), region = 160 }
 0xdf5   : > { %2169 = vst.msk [vmem:[#allocation2] sm:$0xff] %vm1219_vm9, %v2167_v33  ;;  %v2160_v37 = vmul.f32 %v2596_v28, %v2152_v36  ;;  %2790 = vmatprep.mubr.msk.f32.mxu0 (!%p2598_p0), %vm1219_vm9, %v2167_v33 }
 0xdf7   : > { %v2168_v39 = vadd.f32 %v2597_v30, %v2160_v37 }
 0xdf9   : > { %2170 = vst.msk [vmem:[#allocation2 + $0x8] sm:$0xff] %vm1219_vm9, %v2168_v39  ;;  %2791 = vmatmul.mubr.msk.f32.vlgmr.msra.gmra.mrb[0].mxu0 (!%p2598_p0), %vm1219_vm9, %v2168_v39 }
 0xecc   : > { %v2792_v41 = vpop.f32.mrb[0].mxu0 }
 0xecd   : > { %v2264_v42 = vadd.f32 %v2792_v41, %v2599_v38  ;;  %v2258_v48 = vpop.f32.mrb[1].mxu0 }
 0xece   : > { %v2259_v49 = vadd.f32 %v2599_v38, %v2258_v48 }
 0xecf   : > { %2269 = vst.msk [vmem:[%s4387_s19 + $0x8] sm:$0xff] %vm2267_vm12, %v2264_v42 }
 0xed0   : > { %2268 = vst.msk [vmem:[%s4387_s19] sm:$0xff] %vm2267_vm12, %v2259_v49 }
 0xed1 PF: > { %p2982_p6 = scmp.eq.s32.totalorder %s3665_s23, 1  ;;  %s3526_s14 = smov [#allocation20]  }
 0xed2   : > { %s2279_s7 = sshll.u32 %s3526_s14, 4  ;;  %s2280_s7 = int_to_ptr.vmem [resolvable:$true] %s2279_s7 }
 0xed3   : > { %s3422_s21 = scalar_lea.vmem %s2280_s7, 256  ;;  %p3429_p10 = scmp.lt.s32.totalorder %s2280_s7, %s2280_s7 }
 0xed4   : > { %p3423_p13 = scmp.ne.s32.totalorder %s2280_s7, %s3422_s21  ;;  %p3430_p11 = scmp.lt.s32.totalorder %s3422_s21, %s3422_s21 }
 0xed6   : > { %p3424_p7 = pnand %p3423_p13, %p2982_p6  ;;  %p3431_p9 = por %p3430_p11, %p3429_p10 }
 0xed8   : > { %p3425_p8 = pneg %p3424_p7 }
 0xeda   : > { %p3432_p3 = pnand %p3431_p9, %p3425_p8 }
 0xedc   : > { %3435 = shalt.err (!%p3432_p3)
}
 0xedd   : > { %s4388_s12 = sld [smem:[#allocation49_spill]] }
 0xee3   : > { %s3436_s29 = scalar_lea.hbm %s4388_s12, 256 }
 0xee4   : > { %p3437_p2 = scmp.ne.s32.totalorder %s4388_s12, %s3436_s29  ;;  %p3442_p12 = scmp.lt.u32.totalorder %s3436_s29, %s4388_s12 }
 0xee6   : > { %p3438_p1 = pnand %p3437_p2, %p2982_p6 }
 0xee8   : > { %p3439_p5 = pneg %p3438_p1 }
 0xeea   : > { %p3444_p4 = pnand %p3442_p12, %p3439_p5 }
 0xeec   : > { %3447 = shalt.err (!%p3444_p4)
}
 0xeed   : > { %s3527_s15 = smov 128   ;;  %s3528_s4 = smov 8  }
 0xeee   : > { %2928 = dma.vmem_to_hbm [thread:$0]  (%p2982_p6), %s2280_s7, 256, %s4388_s12, [#allocation5], %s3527_s15, %s3527_s15, %s3528_s4  }
 0xeef   : > { %3485 = dma.done.wait (%p2982_p6), [#allocation5], 256  }
 0xef0   : > { %3487 = vsyncadd (%p2982_p6), [#allocation5], 4294967040 }
 0xef1 PF: > { %s4389_s30 = sld [smem:[#allocation28_spill]]  ;;  %s4390_s27 = sld [smem:[#allocation27_spill]] }
 0xef2   : > { %s4391_s29 = sld [smem:[#allocation29_spill]]  ;;  %s4392_s3 = smov %s3494_s28 }
 0xef7   : > { %p35_p0 = scmp.ge.s32.totalorder %s4389_s30, 4   ;;  %s4393_s28 = smov %s4390_s27 }
 0xef9   :  { %37 = sbr.rel (!%p35_p0) target bundleno = 27 (0x1b), region = 253 }
 0xf00   :  { %2298 = vsyncpa [#allocation4], 1 }
 0xf01   :  { %2300 = vsyncpa [#allocation4 + $0x1], 1 }
 0xf02   :  { %2301 = vsyncpa [#allocation7], 1 }
 0xf03   :  { %2302 = vsyncpa [#allocation10], 1 }
 0xf04   :  { %2303 = vsyncpa [#allocation13], 1 }
 0xf05   :  { %2304 = vsyncpa [#allocation5], 1 }
 0xf06   :  { %2306 = vsyncpa [#allocation5 + $0x1], 1 }

</bundles_post_ra>
